<compile_context>
chip_gen: v7x
topology: tpu7x:2x2x1
jax: 0.10.0
libtpu: 0.0.40
codegen_flags: <defaults>
</compile_context>

<pallas_src>
import functools

import jax
import jax.numpy as jnp
from jax.experimental import pallas as pl
from jax.experimental.pallas import tpu as pltpu  # noqa: F401  (TPU backend assumed)

# ---- model hyperparameters (small, consistent with the module) ----
D_MODEL = 32
NHEAD = 4
DIM_FF = 64
NUM_LAYERS = 2
SEQ = 8
BATCH = 2
LN_EPS = 1e-5


def _layer_norm(x, gamma, beta, eps=LN_EPS):
    mu = jnp.mean(x, axis=-1, keepdims=True)
    var = jnp.mean((x - mu) ** 2, axis=-1, keepdims=True)
    return (x - mu) * jax.lax.rsqrt(var + eps) * gamma + beta


def fused_encoder_kernel(x_ref, wslab_ref, w2_ref, vslab_ref, o_ref,
                         *, num_layers, batch, seq, d_model, dim_ff):
    """Entire TransformerEncoder (all layers, all batch elements) in one invocation.

    x_ref:    (B*S, E) activations, rows ordered (b, s).
    wslab_ref:(E, 3E+E+FF+E) = [wqkv | wo | w1 | headproj], x @ W orientation, q pre-scaled.
    w2_ref:   (FF, E).
    vslab_ref:(8, 128) packed bias / LayerNorm vectors.
    """
    E = d_model
    FF = dim_ff
    B, S = batch, seq
    bs = B * S

    x = x_ref[...].astype(jnp.float32)                      # (B*S, E)

    # ---- unpack slabs once (hoisted out of the layer loop) ----
    wslab = wslab_ref[...]
    wqkv = wslab[:, 0:3 * E]                                 # (E, 3E), q cols pre-scaled
    wo = wslab[:, 3 * E:4 * E]                               # (E, E)
    w1 = wslab[:, 4 * E:4 * E + FF]                          # (E, FF)
    headproj = wslab[:, 4 * E + FF:4 * E + FF + E]           # (E, E) block-diag per head
    w2 = w2_ref[...]                                         # (FF, E)

    vec = vslab_ref[...]
    bqkv = vec[0:1, 0:3 * E]                                 # (1, 3E), q part pre-scaled
    bo = vec[1:2, 0:E]
    b1 = vec[1:2, E:E + FF]
    b2 = vec[1:2, E + FF:2 * E + FF]
    g1 = vec[2:3, 0:E]
    be1 = vec[2:3, E:2 * E]
    g2 = vec[2:3, 2 * E:3 * E]
    be2 = vec[2:3, 3 * E:4 * E]

    # _get_clones deep-copies the layer, so all layers share identical weights.
    for _ in range(num_layers):
        # ---- self-attention: fused QKV projection (one MXU matmul for all rows) ----
        qkv = jnp.dot(x, wqkv, preferred_element_type=jnp.float32) + bqkv     # (BS, 3E)
        q3 = qkv[:, 0:E].reshape(B, S, E)          # q scale already folded into weights
        k3 = qkv[:, E:2 * E].reshape(B, S, E)
        v3 = qkv[:, 2 * E:3 * E].reshape(B, S, E)

        # lane-merged-head attention (no per-head slicing, no micro matmuls)
        qe = jnp.broadcast_to(q3[:, :, None, :], (B, S, S, E))   # qe[b,q,k,:] = Q[b,q,:]
        ke = jnp.broadcast_to(k3[:, None, :, :], (B, S, S, E))   # ke[b,q,k,:] = K[b,k,:]
        ve = jnp.broadcast_to(v3[:, None, :, :], (B, S, S, E))   # ve[b,q,k,:] = V[b,k,:]

        prod = (qe * ke).reshape(bs * S, E)                       # (B*S*S, E) = (128, E)
        # per-head sum over d, replicated across that head's dh lanes (single MXU matmul)
        scores = jnp.dot(prod, headproj,
                         preferred_element_type=jnp.float32).reshape(B, S, S, E)

        # softmax over the key axis (axis=2). Max-subtraction intentionally dropped:
        # softmax is shift-invariant and |scores| << 88 here, so exp cannot overflow.
        w = jnp.exp(scores)
        denom = jnp.sum(w, axis=2, keepdims=True)                 # (B, S, 1, E)
        p = w * pl.reciprocal(denom, approx=True)                 # EUP reciprocal

        # ctx[b,q,e] = sum_k p[b,q,k,head(e)] * V[b,k,e]  -> heads already merged in lanes
        ctx = jnp.sum(p * ve, axis=2).reshape(bs, E)              # (BS, E)

        attn = jnp.dot(ctx, wo, preferred_element_type=jnp.float32) + bo      # (BS, E)

        # ---- residual + norm1 (norm_first=False -> post-norm) ----
        y = _layer_norm(x + attn, g1, be1)

        # ---- feed-forward: Linear -> ReLU -> Linear ----
        h1 = jnp.maximum(jnp.dot(y, w1, preferred_element_type=jnp.float32) + b1, 0.0)
        h2 = jnp.dot(h1, w2, preferred_element_type=jnp.float32) + b2

        # ---- residual + norm2 ----
        x = _layer_norm(y + h2, g2, be2)

    o_ref[...] = x.astype(o_ref.dtype)


def init_layer_params(key, d_model, nhead, dim_ff):
    """Synthetic parameters matching nn.TransformerEncoderLayer shapes, stored
    pre-transposed (x @ W orientation) with the query scale folded in."""
    ks = jax.random.split(key, 6)
    s = 0.02
    dh = d_model // nhead
    scale = 1.0 / (dh ** 0.5)

    wqkv = jax.random.normal(ks[0], (d_model, 3 * d_model), jnp.float32) * s
    bqkv = jax.random.normal(ks[1], (1, 3 * d_model), jnp.float32) * s
    # fold 1/sqrt(dh) into the query third of the QKV projection (weight AND bias)
    qscale = jnp.concatenate([jnp.full((d_model,), scale, jnp.float32),
                              jnp.ones((2 * d_model,), jnp.float32)])
    wqkv = wqkv * qscale[None, :]
    bqkv = bqkv * qscale[None, :]

    return dict(
        wqkv=wqkv,
        bqkv=bqkv,
        wo=jax.random.normal(ks[2], (d_model, d_model), jnp.float32) * s,
        bo=jnp.zeros((1, d_model), jnp.float32),
        w1=jax.random.normal(ks[3], (d_model, dim_ff), jnp.float32) * s,
        b1=jax.random.normal(ks[4], (1, dim_ff), jnp.float32) * s,
        w2=jax.random.normal(ks[5], (dim_ff, d_model), jnp.float32) * s,
        b2=jnp.zeros((1, d_model), jnp.float32),
        g1=jnp.ones((1, d_model), jnp.float32),
        be1=jnp.zeros((1, d_model), jnp.float32),
        g2=jnp.ones((1, d_model), jnp.float32),
        be2=jnp.zeros((1, d_model), jnp.float32),
    )


def pack_params(params, d_model, nhead, dim_ff):
    """Pack the 12 parameter arrays into 3 slabs (3 prologue DMAs instead of 12)."""
    E, FF, dh = d_model, dim_ff, d_model // nhead
    assert 3 * E <= 128 and 2 * E + FF <= 128 and 4 * E <= 128, "vslab packing needs wider slab"

    # block-diagonal per-head projector: headproj[e1, e2] = 1 iff e1, e2 in the same head
    head = jnp.arange(E, dtype=jnp.int32) // dh
    headproj = (head[:, None] == head[None, :]).astype(jnp.float32)

    # weight slab: (E, 3E + E + FF + E) = (32, 224)
    wslab = jnp.concatenate([params['wqkv'], params['wo'], params['w1'], headproj], axis=1)

    # vector slab: one (8, 128) VMEM tile holding every bias / LayerNorm vector
    vslab = jnp.zeros((8, 128), jnp.float32)
    vslab = vslab.at[0, 0:3 * E].set(params['bqkv'][0])
    vslab = vslab.at[1, 0:E].set(params['bo'][0])
    vslab = vslab.at[1, E:E + FF].set(params['b1'][0])
    vslab = vslab.at[1, E + FF:2 * E + FF].set(params['b2'][0])
    vslab = vslab.at[2, 0:E].set(params['g1'][0])
    vslab = vslab.at[2, E:2 * E].set(params['be1'][0])
    vslab = vslab.at[2, 2 * E:3 * E].set(params['g2'][0])
    vslab = vslab.at[2, 3 * E:4 * E].set(params['be2'][0])

    return wslab, params['w2'], vslab


def transformer_encoder(src_sbe, wslab, w2, vslab, num_layers, nhead):
    """PyTorch default batch_first=False: src is (S, B, E)."""
    S, B, E = src_sbe.shape
    # Boundary layout plumbing (~2 KiB): present a (B*S, E) activation slab to the kernel.
    x2d = jnp.transpose(src_sbe, (1, 0, 2)).reshape(B * S, E)

    kernel = functools.partial(fused_encoder_kernel, num_layers=num_layers,
                               batch=B, seq=S, d_model=E, dim_ff=w2.shape[0])

    # Single invocation (no grid): every operand is a full-array VMEM block;
    # total footprint ~90 KiB << VMEM on v5e/v6e/v7x. Activation slab aliased to the output.
    out2d = pl.pallas_call(
        kernel,
        out_shape=jax.ShapeDtypeStruct((B * S, E), src_sbe.dtype),
        input_output_aliases={0: 0},
    )(x2d, wslab, w2, vslab)

    # self.norm is None by default -> no final LayerNorm.
    return out2d.reshape(B, S, E).transpose(1, 0, 2)        # back to (S, B, E)


if __name__ == "__main__":
    root = jax.random.PRNGKey(0)
    k_src, k_par = jax.random.split(root)

    src = jax.random.normal(k_src, (SEQ, BATCH, D_MODEL), jnp.float32)   # (S, B, E)
    params = init_layer_params(k_par, D_MODEL, NHEAD, DIM_FF)
    wslab, w2, vslab = pack_params(params, D_MODEL, NHEAD, DIM_FF)

    fwd = jax.jit(transformer_encoder, static_argnums=(4, 5))
    out = fwd(src, wslab, w2, vslab, NUM_LAYERS, NHEAD)
    out = jax.block_until_ready(out)
    assert out.shape == (SEQ, BATCH, D_MODEL)
    print("KERNEL_OK")
</pallas_src>

<mosaic_0001>
module attributes {stable_mosaic.version = 11 : i64} {
  func.func @fused_encoder_kernel(%arg0: memref<16x32xf32, #tpu.memory_space<vmem>>, %arg1: memref<32x224xf32, #tpu.memory_space<vmem>>, %arg2: memref<64x32xf32, #tpu.memory_space<vmem>>, %arg3: memref<8x128xf32, #tpu.memory_space<vmem>>, %arg4: memref<16x32xf32, #tpu.memory_space<vmem>>) attributes {dimension_semantics = [], scalar_prefetch = 0 : i64, scratch_operands = 0 : i64, tpu.core_type = #tpu.core_type<tc>} {
    %c0 = arith.constant 0 : index
    %c0_0 = arith.constant 0 : index
    %0 = vector.load %arg0[%c0, %c0_0] : memref<16x32xf32, #tpu.memory_space<vmem>>, vector<16x32xf32>
    %c0_1 = arith.constant 0 : index
    %c0_2 = arith.constant 0 : index
    %1 = vector.load %arg1[%c0_1, %c0_2] : memref<32x224xf32, #tpu.memory_space<vmem>>, vector<32x224xf32>
    %2 = vector.extract_strided_slice %1 {offsets = [0, 0], sizes = [32, 96], strides = [1, 1]} : vector<32x224xf32> to vector<32x96xf32>
    %3 = vector.extract_strided_slice %1 {offsets = [0, 96], sizes = [32, 32], strides = [1, 1]} : vector<32x224xf32> to vector<32x32xf32>
    %4 = vector.extract_strided_slice %1 {offsets = [0, 128], sizes = [32, 64], strides = [1, 1]} : vector<32x224xf32> to vector<32x64xf32>
    %5 = vector.extract_strided_slice %1 {offsets = [0, 192], sizes = [32, 32], strides = [1, 1]} : vector<32x224xf32> to vector<32x32xf32>
    %c0_3 = arith.constant 0 : index
    %c0_4 = arith.constant 0 : index
    %6 = vector.load %arg2[%c0_3, %c0_4] : memref<64x32xf32, #tpu.memory_space<vmem>>, vector<64x32xf32>
    %c0_5 = arith.constant 0 : index
    %c0_6 = arith.constant 0 : index
    %7 = vector.load %arg3[%c0_5, %c0_6] : memref<8x128xf32, #tpu.memory_space<vmem>>, vector<8x128xf32>
    %8 = vector.extract_strided_slice %7 {offsets = [0, 0], sizes = [1, 96], strides = [1, 1]} : vector<8x128xf32> to vector<1x96xf32>
    %9 = vector.extract_strided_slice %7 {offsets = [1, 0], sizes = [1, 32], strides = [1, 1]} : vector<8x128xf32> to vector<1x32xf32>
    %10 = vector.extract_strided_slice %7 {offsets = [1, 32], sizes = [1, 64], strides = [1, 1]} : vector<8x128xf32> to vector<1x64xf32>
    %11 = vector.extract_strided_slice %7 {offsets = [1, 96], sizes = [1, 32], strides = [1, 1]} : vector<8x128xf32> to vector<1x32xf32>
    %12 = vector.extract_strided_slice %7 {offsets = [2, 0], sizes = [1, 32], strides = [1, 1]} : vector<8x128xf32> to vector<1x32xf32>
    %13 = vector.extract_strided_slice %7 {offsets = [2, 32], sizes = [1, 32], strides = [1, 1]} : vector<8x128xf32> to vector<1x32xf32>
    %14 = vector.extract_strided_slice %7 {offsets = [2, 64], sizes = [1, 32], strides = [1, 1]} : vector<8x128xf32> to vector<1x32xf32>
    %15 = vector.extract_strided_slice %7 {offsets = [2, 96], sizes = [1, 32], strides = [1, 1]} : vector<8x128xf32> to vector<1x32xf32>
    %cst = arith.constant dense<0.000000e+00> : vector<16x96xf32>
    %16 = tpu.matmul %0, %2, %cst {dimension_numbers = #tpu.dot_dimension_numbers<[1], [0], [0], [1], [0, 0, 1, 1], [], []>} : vector<16x32xf32>, vector<32x96xf32>, vector<16x96xf32> -> vector<16x96xf32>
    %17 = vector.broadcast %8 : vector<1x96xf32> to vector<16x96xf32>
    %18 = arith.addf %16, %17 : vector<16x96xf32>
    %19 = vector.extract_strided_slice %18 {offsets = [0, 0], sizes = [16, 32], strides = [1, 1]} : vector<16x96xf32> to vector<16x32xf32>
    %20 = vector.shape_cast %19 : vector<16x32xf32> to vector<2x8x32xf32>
    %21 = vector.extract_strided_slice %18 {offsets = [0, 32], sizes = [16, 32], strides = [1, 1]} : vector<16x96xf32> to vector<16x32xf32>
    %22 = vector.shape_cast %21 : vector<16x32xf32> to vector<2x8x32xf32>
    %23 = vector.extract_strided_slice %18 {offsets = [0, 64], sizes = [16, 32], strides = [1, 1]} : vector<16x96xf32> to vector<16x32xf32>
    %24 = vector.shape_cast %23 : vector<16x32xf32> to vector<2x8x32xf32>
    %25 = vector.shape_cast %20 : vector<2x8x32xf32> to vector<2x8x1x32xf32>
    %26 = vector.shape_cast %25 : vector<2x8x1x32xf32> to vector<2x8x1x32xf32>
    %27 = vector.broadcast %26 : vector<2x8x1x32xf32> to vector<2x8x8x32xf32>
    %28 = vector.shape_cast %22 : vector<2x8x32xf32> to vector<2x1x8x32xf32>
    %29 = vector.shape_cast %28 : vector<2x1x8x32xf32> to vector<2x1x8x32xf32>
    %30 = vector.broadcast %29 : vector<2x1x8x32xf32> to vector<2x8x8x32xf32>
    %31 = vector.shape_cast %24 : vector<2x8x32xf32> to vector<2x1x8x32xf32>
    %32 = vector.shape_cast %31 : vector<2x1x8x32xf32> to vector<2x1x8x32xf32>
    %33 = vector.broadcast %32 : vector<2x1x8x32xf32> to vector<2x8x8x32xf32>
    %34 = arith.mulf %27, %30 : vector<2x8x8x32xf32>
    %35 = vector.shape_cast %34 : vector<2x8x8x32xf32> to vector<128x32xf32>
    %cst_7 = arith.constant dense<0.000000e+00> : vector<128x32xf32>
    %36 = tpu.matmul %35, %5, %cst_7 {dimension_numbers = #tpu.dot_dimension_numbers<[1], [0], [0], [1], [0, 0, 1, 1], [], []>} : vector<128x32xf32>, vector<32x32xf32>, vector<128x32xf32> -> vector<128x32xf32>
    %37 = vector.shape_cast %36 : vector<128x32xf32> to vector<2x8x8x32xf32>
    %38 = math.exp %37 : vector<2x8x8x32xf32>
    %cst_8 = arith.constant dense<0.000000e+00> : vector<2x8x32xf32>
    %39 = vector.multi_reduction <add>, %38, %cst_8 [2] : vector<2x8x8x32xf32> to vector<2x8x32xf32>
    %40 = vector.shape_cast %39 : vector<2x8x32xf32> to vector<2x8x1x32xf32>
    %41 = tpu.reciprocal %40 {approx = true} : vector<2x8x1x32xf32> -> vector<2x8x1x32xf32>
    %42 = vector.broadcast %41 : vector<2x8x1x32xf32> to vector<2x8x8x32xf32>
    %43 = arith.mulf %38, %42 : vector<2x8x8x32xf32>
    %44 = arith.mulf %43, %33 : vector<2x8x8x32xf32>
    %cst_9 = arith.constant dense<0.000000e+00> : vector<2x8x32xf32>
    %45 = vector.multi_reduction <add>, %44, %cst_9 [2] : vector<2x8x8x32xf32> to vector<2x8x32xf32>
    %46 = vector.shape_cast %45 : vector<2x8x32xf32> to vector<16x32xf32>
    %cst_10 = arith.constant dense<0.000000e+00> : vector<16x32xf32>
    %47 = tpu.matmul %46, %3, %cst_10 {dimension_numbers = #tpu.dot_dimension_numbers<[1], [0], [0], [1], [0, 0, 1, 1], [], []>} : vector<16x32xf32>, vector<32x32xf32>, vector<16x32xf32> -> vector<16x32xf32>
    %48 = vector.broadcast %9 : vector<1x32xf32> to vector<16x32xf32>
    %49 = arith.addf %47, %48 : vector<16x32xf32>
    %50 = arith.addf %0, %49 : vector<16x32xf32>
    %cst_11 = arith.constant dense<0.000000e+00> : vector<16xf32>
    %51 = vector.multi_reduction <add>, %50, %cst_11 [1] : vector<16x32xf32> to vector<16xf32>
    %52 = vector.shape_cast %51 : vector<16xf32> to vector<16x1xf32>
    %cst_12 = arith.constant 3.200000e+01 : f32
    %53 = vector.broadcast %cst_12 : f32 to vector<16x1xf32>
    %54 = arith.divf %52, %53 : vector<16x1xf32>
    %55 = vector.broadcast %54 : vector<16x1xf32> to vector<16x32xf32>
    %56 = arith.subf %50, %55 : vector<16x32xf32>
    %57 = arith.mulf %56, %56 : vector<16x32xf32>
    %cst_13 = arith.constant dense<0.000000e+00> : vector<16xf32>
    %58 = vector.multi_reduction <add>, %57, %cst_13 [1] : vector<16x32xf32> to vector<16xf32>
    %59 = vector.shape_cast %58 : vector<16xf32> to vector<16x1xf32>
    %cst_14 = arith.constant 3.200000e+01 : f32
    %60 = vector.broadcast %cst_14 : f32 to vector<16x1xf32>
    %61 = arith.divf %59, %60 : vector<16x1xf32>
    %62 = vector.broadcast %54 : vector<16x1xf32> to vector<16x32xf32>
    %63 = arith.subf %50, %62 : vector<16x32xf32>
    %cst_15 = arith.constant 9.99999974E-6 : f32
    %64 = vector.broadcast %cst_15 : f32 to vector<16x1xf32>
    %65 = arith.addf %61, %64 : vector<16x1xf32>
    %66 = math.rsqrt %65 : vector<16x1xf32>
    %67 = vector.broadcast %66 : vector<16x1xf32> to vector<16x32xf32>
    %68 = arith.mulf %63, %67 : vector<16x32xf32>
    %69 = vector.broadcast %12 : vector<1x32xf32> to vector<16x32xf32>
    %70 = arith.mulf %68, %69 : vector<16x32xf32>
    %71 = vector.broadcast %13 : vector<1x32xf32> to vector<16x32xf32>
    %72 = arith.addf %70, %71 : vector<16x32xf32>
    %cst_16 = arith.constant dense<0.000000e+00> : vector<16x64xf32>
    %73 = tpu.matmul %72, %4, %cst_16 {dimension_numbers = #tpu.dot_dimension_numbers<[1], [0], [0], [1], [0, 0, 1, 1], [], []>} : vector<16x32xf32>, vector<32x64xf32>, vector<16x64xf32> -> vector<16x64xf32>
    %74 = vector.broadcast %10 : vector<1x64xf32> to vector<16x64xf32>
    %75 = arith.addf %73, %74 : vector<16x64xf32>
    %cst_17 = arith.constant 0.000000e+00 : f32
    %76 = vector.broadcast %cst_17 : f32 to vector<16x64xf32>
    %77 = arith.maximumf %75, %76 : vector<16x64xf32>
    %cst_18 = arith.constant dense<0.000000e+00> : vector<16x32xf32>
    %78 = tpu.matmul %77, %6, %cst_18 {dimension_numbers = #tpu.dot_dimension_numbers<[1], [0], [0], [1], [0, 0, 1, 1], [], []>} : vector<16x64xf32>, vector<64x32xf32>, vector<16x32xf32> -> vector<16x32xf32>
    %79 = vector.broadcast %11 : vector<1x32xf32> to vector<16x32xf32>
    %80 = arith.addf %78, %79 : vector<16x32xf32>
    %81 = arith.addf %72, %80 : vector<16x32xf32>
    %cst_19 = arith.constant dense<0.000000e+00> : vector<16xf32>
    %82 = vector.multi_reduction <add>, %81, %cst_19 [1] : vector<16x32xf32> to vector<16xf32>
    %83 = vector.shape_cast %82 : vector<16xf32> to vector<16x1xf32>
    %cst_20 = arith.constant 3.200000e+01 : f32
    %84 = vector.broadcast %cst_20 : f32 to vector<16x1xf32>
    %85 = arith.divf %83, %84 : vector<16x1xf32>
    %86 = vector.broadcast %85 : vector<16x1xf32> to vector<16x32xf32>
    %87 = arith.subf %81, %86 : vector<16x32xf32>
    %88 = arith.mulf %87, %87 : vector<16x32xf32>
    %cst_21 = arith.constant dense<0.000000e+00> : vector<16xf32>
    %89 = vector.multi_reduction <add>, %88, %cst_21 [1] : vector<16x32xf32> to vector<16xf32>
    %90 = vector.shape_cast %89 : vector<16xf32> to vector<16x1xf32>
    %cst_22 = arith.constant 3.200000e+01 : f32
    %91 = vector.broadcast %cst_22 : f32 to vector<16x1xf32>
    %92 = arith.divf %90, %91 : vector<16x1xf32>
    %93 = vector.broadcast %85 : vector<16x1xf32> to vector<16x32xf32>
    %94 = arith.subf %81, %93 : vector<16x32xf32>
    %cst_23 = arith.constant 9.99999974E-6 : f32
    %95 = vector.broadcast %cst_23 : f32 to vector<16x1xf32>
    %96 = arith.addf %92, %95 : vector<16x1xf32>
    %97 = math.rsqrt %96 : vector<16x1xf32>
    %98 = vector.broadcast %97 : vector<16x1xf32> to vector<16x32xf32>
    %99 = arith.mulf %94, %98 : vector<16x32xf32>
    %100 = vector.broadcast %14 : vector<1x32xf32> to vector<16x32xf32>
    %101 = arith.mulf %99, %100 : vector<16x32xf32>
    %102 = vector.broadcast %15 : vector<1x32xf32> to vector<16x32xf32>
    %103 = arith.addf %101, %102 : vector<16x32xf32>
    %cst_24 = arith.constant dense<0.000000e+00> : vector<16x96xf32>
    %104 = tpu.matmul %103, %2, %cst_24 {dimension_numbers = #tpu.dot_dimension_numbers<[1], [0], [0], [1], [0, 0, 1, 1], [], []>} : vector<16x32xf32>, vector<32x96xf32>, vector<16x96xf32> -> vector<16x96xf32>
    %105 = vector.broadcast %8 : vector<1x96xf32> to vector<16x96xf32>
    %106 = arith.addf %104, %105 : vector<16x96xf32>
    %107 = vector.extract_strided_slice %106 {offsets = [0, 0], sizes = [16, 32], strides = [1, 1]} : vector<16x96xf32> to vector<16x32xf32>
    %108 = vector.shape_cast %107 : vector<16x32xf32> to vector<2x8x32xf32>
    %109 = vector.extract_strided_slice %106 {offsets = [0, 32], sizes = [16, 32], strides = [1, 1]} : vector<16x96xf32> to vector<16x32xf32>
    %110 = vector.shape_cast %109 : vector<16x32xf32> to vector<2x8x32xf32>
    %111 = vector.extract_strided_slice %106 {offsets = [0, 64], sizes = [16, 32], strides = [1, 1]} : vector<16x96xf32> to vector<16x32xf32>
    %112 = vector.shape_cast %111 : vector<16x32xf32> to vector<2x8x32xf32>
    %113 = vector.shape_cast %108 : vector<2x8x32xf32> to vector<2x8x1x32xf32>
    %114 = vector.shape_cast %113 : vector<2x8x1x32xf32> to vector<2x8x1x32xf32>
    %115 = vector.broadcast %114 : vector<2x8x1x32xf32> to vector<2x8x8x32xf32>
    %116 = vector.shape_cast %110 : vector<2x8x32xf32> to vector<2x1x8x32xf32>
    %117 = vector.shape_cast %116 : vector<2x1x8x32xf32> to vector<2x1x8x32xf32>
    %118 = vector.broadcast %117 : vector<2x1x8x32xf32> to vector<2x8x8x32xf32>
    %119 = vector.shape_cast %112 : vector<2x8x32xf32> to vector<2x1x8x32xf32>
    %120 = vector.shape_cast %119 : vector<2x1x8x32xf32> to vector<2x1x8x32xf32>
    %121 = vector.broadcast %120 : vector<2x1x8x32xf32> to vector<2x8x8x32xf32>
    %122 = arith.mulf %115, %118 : vector<2x8x8x32xf32>
    %123 = vector.shape_cast %122 : vector<2x8x8x32xf32> to vector<128x32xf32>
    %cst_25 = arith.constant dense<0.000000e+00> : vector<128x32xf32>
    %124 = tpu.matmul %123, %5, %cst_25 {dimension_numbers = #tpu.dot_dimension_numbers<[1], [0], [0], [1], [0, 0, 1, 1], [], []>} : vector<128x32xf32>, vector<32x32xf32>, vector<128x32xf32> -> vector<128x32xf32>
    %125 = vector.shape_cast %124 : vector<128x32xf32> to vector<2x8x8x32xf32>
    %126 = math.exp %125 : vector<2x8x8x32xf32>
    %cst_26 = arith.constant dense<0.000000e+00> : vector<2x8x32xf32>
    %127 = vector.multi_reduction <add>, %126, %cst_26 [2] : vector<2x8x8x32xf32> to vector<2x8x32xf32>
    %128 = vector.shape_cast %127 : vector<2x8x32xf32> to vector<2x8x1x32xf32>
    %129 = tpu.reciprocal %128 {approx = true} : vector<2x8x1x32xf32> -> vector<2x8x1x32xf32>
    %130 = vector.broadcast %129 : vector<2x8x1x32xf32> to vector<2x8x8x32xf32>
    %131 = arith.mulf %126, %130 : vector<2x8x8x32xf32>
    %132 = arith.mulf %131, %121 : vector<2x8x8x32xf32>
    %cst_27 = arith.constant dense<0.000000e+00> : vector<2x8x32xf32>
    %133 = vector.multi_reduction <add>, %132, %cst_27 [2] : vector<2x8x8x32xf32> to vector<2x8x32xf32>
    %134 = vector.shape_cast %133 : vector<2x8x32xf32> to vector<16x32xf32>
    %cst_28 = arith.constant dense<0.000000e+00> : vector<16x32xf32>
    %135 = tpu.matmul %134, %3, %cst_28 {dimension_numbers = #tpu.dot_dimension_numbers<[1], [0], [0], [1], [0, 0, 1, 1], [], []>} : vector<16x32xf32>, vector<32x32xf32>, vector<16x32xf32> -> vector<16x32xf32>
    %136 = vector.broadcast %9 : vector<1x32xf32> to vector<16x32xf32>
    %137 = arith.addf %135, %136 : vector<16x32xf32>
    %138 = arith.addf %103, %137 : vector<16x32xf32>
    %cst_29 = arith.constant dense<0.000000e+00> : vector<16xf32>
    %139 = vector.multi_reduction <add>, %138, %cst_29 [1] : vector<16x32xf32> to vector<16xf32>
    %140 = vector.shape_cast %139 : vector<16xf32> to vector<16x1xf32>
    %cst_30 = arith.constant 3.200000e+01 : f32
    %141 = vector.broadcast %cst_30 : f32 to vector<16x1xf32>
    %142 = arith.divf %140, %141 : vector<16x1xf32>
    %143 = vector.broadcast %142 : vector<16x1xf32> to vector<16x32xf32>
    %144 = arith.subf %138, %143 : vector<16x32xf32>
    %145 = arith.mulf %144, %144 : vector<16x32xf32>
    %cst_31 = arith.constant dense<0.000000e+00> : vector<16xf32>
    %146 = vector.multi_reduction <add>, %145, %cst_31 [1] : vector<16x32xf32> to vector<16xf32>
    %147 = vector.shape_cast %146 : vector<16xf32> to vector<16x1xf32>
    %cst_32 = arith.constant 3.200000e+01 : f32
    %148 = vector.broadcast %cst_32 : f32 to vector<16x1xf32>
    %149 = arith.divf %147, %148 : vector<16x1xf32>
    %150 = vector.broadcast %142 : vector<16x1xf32> to vector<16x32xf32>
    %151 = arith.subf %138, %150 : vector<16x32xf32>
    %cst_33 = arith.constant 9.99999974E-6 : f32
    %152 = vector.broadcast %cst_33 : f32 to vector<16x1xf32>
    %153 = arith.addf %149, %152 : vector<16x1xf32>
    %154 = math.rsqrt %153 : vector<16x1xf32>
    %155 = vector.broadcast %154 : vector<16x1xf32> to vector<16x32xf32>
    %156 = arith.mulf %151, %155 : vector<16x32xf32>
    %157 = vector.broadcast %12 : vector<1x32xf32> to vector<16x32xf32>
    %158 = arith.mulf %156, %157 : vector<16x32xf32>
    %159 = vector.broadcast %13 : vector<1x32xf32> to vector<16x32xf32>
    %160 = arith.addf %158, %159 : vector<16x32xf32>
    %cst_34 = arith.constant dense<0.000000e+00> : vector<16x64xf32>
    %161 = tpu.matmul %160, %4, %cst_34 {dimension_numbers = #tpu.dot_dimension_numbers<[1], [0], [0], [1], [0, 0, 1, 1], [], []>} : vector<16x32xf32>, vector<32x64xf32>, vector<16x64xf32> -> vector<16x64xf32>
    %162 = vector.broadcast %10 : vector<1x64xf32> to vector<16x64xf32>
    %163 = arith.addf %161, %162 : vector<16x64xf32>
    %cst_35 = arith.constant 0.000000e+00 : f32
    %164 = vector.broadcast %cst_35 : f32 to vector<16x64xf32>
    %165 = arith.maximumf %163, %164 : vector<16x64xf32>
    %cst_36 = arith.constant dense<0.000000e+00> : vector<16x32xf32>
    %166 = tpu.matmul %165, %6, %cst_36 {dimension_numbers = #tpu.dot_dimension_numbers<[1], [0], [0], [1], [0, 0, 1, 1], [], []>} : vector<16x64xf32>, vector<64x32xf32>, vector<16x32xf32> -> vector<16x32xf32>
    %167 = vector.broadcast %11 : vector<1x32xf32> to vector<16x32xf32>
    %168 = arith.addf %166, %167 : vector<16x32xf32>
    %169 = arith.addf %160, %168 : vector<16x32xf32>
    %cst_37 = arith.constant dense<0.000000e+00> : vector<16xf32>
    %170 = vector.multi_reduction <add>, %169, %cst_37 [1] : vector<16x32xf32> to vector<16xf32>
    %171 = vector.shape_cast %170 : vector<16xf32> to vector<16x1xf32>
    %cst_38 = arith.constant 3.200000e+01 : f32
    %172 = vector.broadcast %cst_38 : f32 to vector<16x1xf32>
    %173 = arith.divf %171, %172 : vector<16x1xf32>
    %174 = vector.broadcast %173 : vector<16x1xf32> to vector<16x32xf32>
    %175 = arith.subf %169, %174 : vector<16x32xf32>
    %176 = arith.mulf %175, %175 : vector<16x32xf32>
    %cst_39 = arith.constant dense<0.000000e+00> : vector<16xf32>
    %177 = vector.multi_reduction <add>, %176, %cst_39 [1] : vector<16x32xf32> to vector<16xf32>
    %178 = vector.shape_cast %177 : vector<16xf32> to vector<16x1xf32>
    %cst_40 = arith.constant 3.200000e+01 : f32
    %179 = vector.broadcast %cst_40 : f32 to vector<16x1xf32>
    %180 = arith.divf %178, %179 : vector<16x1xf32>
    %181 = vector.broadcast %173 : vector<16x1xf32> to vector<16x32xf32>
    %182 = arith.subf %169, %181 : vector<16x32xf32>
    %cst_41 = arith.constant 9.99999974E-6 : f32
    %183 = vector.broadcast %cst_41 : f32 to vector<16x1xf32>
    %184 = arith.addf %180, %183 : vector<16x1xf32>
    %185 = math.rsqrt %184 : vector<16x1xf32>
    %186 = vector.broadcast %185 : vector<16x1xf32> to vector<16x32xf32>
    %187 = arith.mulf %182, %186 : vector<16x32xf32>
    %188 = vector.broadcast %14 : vector<1x32xf32> to vector<16x32xf32>
    %189 = arith.mulf %187, %188 : vector<16x32xf32>
    %190 = vector.broadcast %15 : vector<1x32xf32> to vector<16x32xf32>
    %191 = arith.addf %189, %190 : vector<16x32xf32>
    %c0_42 = arith.constant 0 : index
    %c0_43 = arith.constant 0 : index
    %192 = vector.load %arg4[%c0_42, %c0_43] : memref<16x32xf32, #tpu.memory_space<vmem>>, vector<16x32xf32>
    tpu.vector_store %arg4[%c0_42, %c0_43], %191 {strides = array<i32>} : memref<16x32xf32, #tpu.memory_space<vmem>>, vector<16x32xf32>,
    return
  }
}

</mosaic_0001>

<bundles_post_ra>
// kernel: transformer_encoder.1
= control target key start
LH: loop header
LB: loop body
LE: loop exit
PB: predicated region body
PF: predicated region fallthrough
CT: control target
= control target key end

     0   :  { %vm40_vm0 = vcmask 261120   ;;  %s2937_s7 = smov 64   ;;  %v36_v24 = vlaneseq  ;;  %s2938_s11 = smov 96   ;;  %v2940_v35 = vmov 1966171168   ;;  %vm863_vm1 = vcmask 1041409   ;;  %s3616_s1 = inlined_call_operand.vmem [shape: f32[32,224], index: 1, kind: input, shape index: {}]   ;;  %s3617_s0 = inlined_call_operand.vmem [shape: f32[16,32], index: 0, kind: input, shape index: {}, may-alias: {0,4}]   ;;  %s3618_s3 = inlined_call_operand.vmem [shape: f32[8,128], index: 3, kind: input, shape index: {}]   ;;  %s3619_s2 = inlined_call_operand.vmem [shape: f32[64,32], index: 2, kind: input, shape index: {}]   ;;  %s3620_s4 = inlined_call_operand.vmem [shape: f32[16,32], index: 4, kind: output, shape index: {}, may-alias: {0,4}]  }
   0x1   :  { %v19_v0 = vld [vmem:[%s3616_s1] sm:$0xff]  ;;  %v21_v1 = vld [vmem:[%s3616_s1 + $0x10] sm:$0xff]  ;;  %v20_v7 = vld [vmem:[%s3616_s1 + $0x8] sm:$0xff]  ;;  %v126_v36 = vunpack.c.l.s4 %v2940_v35  ;;  %vm865_vm2 = vcmask 1042434   ;;  %vm867_vm3 = vcmask 1043459   ;;  %vm869_vm4 = vcmask 1044484  }
   0x2   :  { %v23_v2 = vld [vmem:[%s3616_s1 + $0x20] sm:$0xff]  ;;  %v2975_v3 = vpack.c.bf16 %v21_v1, %v19_v0  ;;  %v25_v4 = vld [vmem:[%s3616_s1 + $0x30] sm:$0xff]  ;;  %v22_v8 = vld [vmem:[%s3616_s1 + $0x18] sm:$0xff]  ;;  %v3021_v25 = vshrl.u32 %v36_v24, 7  ;;  %v2781_v33 = vpack.i.bf16 %v21_v1, %v19_v0  ;;  %vm871_vm5 = vcmask 1045509  }
   0x3   :  { %v17_v5 = vld [vmem:[%s3617_s0] sm:$0xff]  ;;  %v2983_v6 = vpack.c.bf16 %v25_v4, %v23_v2  ;;  %v24_v9 = vld [vmem:[%s3616_s1 + $0x28] sm:$0xff]  ;;  %v2771_v10 = vpack.i.bf16 %v22_v8, %v20_v7  ;;  %v2996_v11 = vpack.c.bf16 %v22_v8, %v20_v7  ;;  %v26_v12 = vld [vmem:[%s3616_s1 + $0x38] sm:$0xff]  ;;  %v2786_v34 = vpack.i.bf16 %v25_v4, %v23_v2 }
   0x4   :  { %2511 = vmatprep.mubr.msk.f32.mxu0 %vm40_vm0, %v17_v5  ;;  %2672 = vmatprep.subr.bf16.mxu0 %v2975_v3  ;;  %v3002_v13 = vpack.c.bf16 %v26_v12, %v24_v9  ;;  %v2776_v14 = vpack.i.bf16 %v26_v12, %v24_v9  ;;  %v18_v15 = vld [vmem:[%s3617_s0 + $0x8] sm:$0xff]  ;;  %v3024_v26 = vsub.s32 0, %v3021_v25  ;;  %v3029_v27 = vld [vmem:[%s3618_s3] sm:$0xff]  ;;  %s2939_s3 = smov 32   ;;  %v127_v37 = vunpack.c.0.s8 %v126_v36 }
   0x5   :  { %2674 = vmatpush3.bf16.msra.mxu0 %v2975_v3  ;;  %2772 = vrot.lane.b32.xlu0 %v2771_v10, %s2937_s7  ;;  %vm873_vm6 = vcmask 1046534   ;;  %vm875_vm7 = vcmask 1047559   ;;  %vm1110_vm8 = vcmask 523264  }
   0x6   :  { %2676 = vmatprep.subr.bf16.mxu0 %v2983_v6  ;;  %v3033_v28 = vrot.slane %v3029_v27, %v3024_v26  ;;  %v3044_v38 = vsub.s32 %v127_v37, %v3021_v25 }
   0x9   :  { %2678 = vmatpush3.bf16.msra.mxu0 %v2983_v6  ;;  %2777 = vrot.lane.b32.xlu0 %v2776_v14, %s2937_s7 }
   0xc   :  { %2512 = vmatmul.mubr.msk.f32.vlgmr.msra.gmra.mrb[0].mxu0 %vm40_vm0, %v18_v15 }
  0x77   :  { %v2773_v16 = vpop.permute.xlu0 %2772 }
  0x78   :  { %v2775_v17 = vunpack.i.h.bf16 %v2773_v16  ;;  %v2774_v18 = vunpack.i.l.bf16 %v2773_v16 }
  0x7a   :  { %v3012_v19 = vpack.c.bf16 %v2775_v17, %v2774_v18 }
  0x7b   :  { %v2778_v20 = vpop.permute.xlu0 %2777 }
  0x7c   :  { %v2780_v21 = vunpack.i.h.bf16 %v2778_v20  ;;  %v2779_v22 = vunpack.i.l.bf16 %v2778_v20  ;;  %2680 = vmatprep.subr.bf16.mxu1 %v3012_v19 }
  0x7d   :  { %2682 = vmatpush3.bf16.msra.mxu1 %v3012_v19 }
  0x7e   :  { %v3016_v23 = vpack.c.bf16 %v2780_v21, %v2779_v22 }
  0x80   :  { %2684 = vmatprep.subr.bf16.mxu1 %v3016_v23 }
  0x81   :  { %2686 = vmatpush3.bf16.msra.mxu1 %v3016_v23 }
  0x82   :  { %2720 = vmatprep.subr.bf16.mxu1 %v2975_v3 }
  0xdf   :  { %v2513_v29 = vpop.f32.mrb[0].mxu0 }
  0xe0   :  { %v113_v30 = vpop.f32.mrb[1].mxu0  ;;  %v119_v32 = vadd.f32 %v2513_v29, %v3033_v28 }
  0xe1   :  { %v114_v31 = vadd.f32 %v113_v30, %v3033_v28 }
  0xe2   :  { %v180_v56 = vrot.slane %v119_v32, %v3044_v38  ;;  %v173_v63 = vcombine.high %v119_v32, %v119_v32 }
  0xe3   :  { %709 = vrot.lane.b32.xlu0 %v114_v31, %s2937_s7  ;;  %302 = vrot.lane.b32.xlu1 %v114_v31, %s2938_s11  ;;  %v131_v39 = vrot.slane %v114_v31, %v3044_v38  ;;  %v124_v41 = vcombine.high %v114_v31, %v114_v31 }
  0xe4   :  { %v188_v0 = vcombine.high %v180_v56, %v180_v56  ;;  %v196_v4 = vrot.slane %v180_v56, %v3044_v38  ;;  %v187_v8 = vrot.slane %v173_v63, %v3044_v38 }
  0xe5   :  { %v139_v40 = vcombine.high %v131_v39, %v131_v39  ;;  %v147_v42 = vrot.slane %v131_v39, %v3044_v38  ;;  %v138_v44 = vrot.slane %v124_v41, %v3044_v38 }
  0xe6   :  { %v210_v12 = vrot.slane %v188_v0, %v3044_v38  ;;  %v257_v14 = vrot.slane %v196_v4, %v3024_v26  ;;  %v218_v15 = vcombine.high %v196_v4, %v196_v4  ;;  %v189_v18 = vcombine.high %v187_v8, %v187_v8 }
  0xe7   :  { %304 = vrot.lane.b32.xlu1 %v119_v32, %s2938_s11  ;;  %2782 = vrot.lane.b32.xlu0 %v2781_v33, %s2939_s3  ;;  %v161_v43 = vrot.slane %v139_v40, %v3044_v38  ;;  %v169_v45 = vcombine.high %v147_v42, %v147_v42  ;;  %v225_v46 = vrot.slane %v147_v42, %v3024_v26 }
  0xe8   :  { %v140_v48 = vcombine.high %v138_v44, %v138_v44  ;;  %v154_v54 = vrot.slane %v138_v44, %v3044_v38  ;;  %v220_v20 = vcombine.high %v210_v12, %v210_v12  ;;  %v265_v21 = vrot.slane %v218_v15, %v3024_v26 }
  0xe9   :  { %v229_v47 = vrot.slane %v161_v43, %v3024_v26  ;;  %v171_v50 = vcombine.high %v161_v43, %v161_v43  ;;  %v233_v53 = vrot.slane %v169_v45, %v3024_v26  ;;  %v203_v22 = vrot.slane %v187_v8, %v3044_v38 }
  0xea   :  { %v168_v58 = vrot.slane %v140_v48, %v3044_v38  ;;  %v241_v59 = vrot.slane %v154_v54, %v3024_v26  ;;  %v170_v60 = vcombine.high %v154_v54, %v154_v54  ;;  %v269_v30 = vrot.slane %v220_v20, %v3024_v26 }
  0xeb   :  { %711 = vrot.lane.b32.xlu1 %v119_v32, %s2937_s7  ;;  %v237_v57 = vrot.slane %v171_v50, %v3024_v26  ;;  %v217_v31 = vrot.slane %v189_v18, %v3044_v38  ;;  %v273_v32 = vrot.slane %v203_v22, %v3024_v26  ;;  %v219_v33 = vcombine.high %v203_v22, %v203_v22 }
  0xec   :  { %v245_v1 = vrot.slane %v168_v58, %v3024_v26  ;;  %v172_v2 = vcombine.high %v168_v58, %v168_v58  ;;  %v249_v5 = vrot.slane %v170_v60, %v3024_v26 }
  0xed   :  { %v277_v36 = vrot.slane %v217_v31, %v3024_v26  ;;  %v221_v37 = vcombine.high %v217_v31, %v217_v31  ;;  %v281_v39 = vrot.slane %v219_v33, %v3024_v26 }
  0xee   :  { %v253_v10 = vrot.slane %v172_v2, %v3024_v26 }
  0xef   :  { %2787 = vrot.lane.b32.xlu1 %v2786_v34, %s2939_s3  ;;  %v285_v42 = vrot.slane %v221_v37, %v3024_v26 }
 0x155   :  { %v303_v49 = vpop.permute.xlu1 %302  ;;  %v3093_v44 = vpop.permute.xlu0 %709 }
 0x156   :  { %v308_v51 = vmul.f32 %v303_v49, %v225_v46  ;;  %v309_v52 = vmul.f32 %v303_v49, %v229_v47  ;;  %v310_v55 = vmul.f32 %v303_v49, %v233_v53  ;;  %v311_v61 = vmul.f32 %v303_v49, %v237_v57 }
 0x157   :  { %v312_v62 = vmul.f32 %v303_v49, %v241_v59  ;;  %v313_v7 = vmul.f32 %v303_v49, %v245_v1  ;;  %v315_v16 = vmul.f32 %v303_v49, %v253_v10 }
 0x158   :  { %2522 = vmatprep.mubr.msk.f32.mxu1 %vm40_vm0, %v308_v51 }
 0x159   :  { %2523 = vmatmul.mubr.msk.f32.vlgmr.msra.gmra.mrb[0].mxu1 %vm40_vm0, %v309_v52  ;;  %v305_v9 = vpop.permute.xlu1 %304  ;;  %v2783_v46 = vpop.permute.xlu0 %2782 }
 0x15a   :  { %2525 = vmatprep.mubr.msk.f32.mxu1 %vm40_vm0, %v310_v55  ;;  %2722 = vmatpush3.bf16.msra.mxu1 %v2975_v3  ;;  %v314_v3 = vmul.f32 %v303_v49, %v249_v5  ;;  %v316_v17 = vmul.f32 %v305_v9, %v257_v14  ;;  %v318_v29 = vmul.f32 %v305_v9, %v265_v21  ;;  %v2785_v48 = vunpack.i.h.bf16 %v2783_v46 }
 0x15b   :  { %2724 = vmatprep.subr.bf16.mxu1 %v2983_v6  ;;  %v319_v34 = vmul.f32 %v305_v9, %v269_v30  ;;  %v320_v35 = vmul.f32 %v305_v9, %v273_v32  ;;  %v321_v40 = vmul.f32 %v305_v9, %v277_v36  ;;  %v322_v41 = vmul.f32 %v305_v9, %v281_v39 }
 0x15c   :  { %v323_v43 = vmul.f32 %v305_v9, %v285_v42  ;;  %v2784_v49 = vunpack.i.l.bf16 %v2783_v46 }
 0x15d   :  { %2526 = vmatmul.mubr.msk.f32.gmra.mrb[2].mxu1 %vm40_vm0, %v311_v61  ;;  %v3095_v45 = vpop.permute.xlu1 %711 }
 0x15e   :  { %2528 = vmatprep.mubr.msk.f32.mxu1 %vm40_vm0, %v312_v62  ;;  %2726 = vmatpush3.bf16.msra.mxu1 %v2983_v6  ;;  %v261_v6 = vrot.slane %v210_v12, %v3024_v26  ;;  %v3097_v52 = vpack.c.bf16 %v2785_v48, %v2784_v49 }
 0x160   :  { %v317_v24 = vmul.f32 %v305_v9, %v261_v6  ;;  %2688 = vmatprep.subr.bf16.mxu0 %v3097_v52  ;;  %2736 = vmatprep.subr.bf16.mxu1 %v3097_v52 }
 0x161   :  { %2529 = vmatmul.mubr.msk.f32.gmra.mrb[4].mxu1 %vm40_vm0, %v313_v7  ;;  %v2788_v47 = vpop.permute.xlu1 %2787  ;;  %2690 = vmatpush3.bf16.msra.mxu0 %v3097_v52 }
 0x162   :  { %2531 = vmatprep.mubr.msk.f32.mxu1 %vm40_vm0, %v314_v3  ;;  %v2790_v50 = vunpack.i.h.bf16 %v2788_v47  ;;  %v2789_v51 = vunpack.i.l.bf16 %v2788_v47 }
 0x164   :  { %v3099_v53 = vpack.c.bf16 %v2790_v50, %v2789_v51 }
 0x165   :  { %2532 = vmatmul.mubr.msk.f32.gmra.mrb[6].mxu1 %vm40_vm0, %v315_v16 }
 0x166   :  { %2534 = vmatprep.mubr.msk.f32.mxu1 %vm40_vm0, %v316_v17  ;;  %2692 = vmatprep.subr.bf16.mxu0 %v3099_v53 }
 0x167   :  { %2694 = vmatpush3.bf16.msra.mxu0 %v3099_v53 }
 0x168   :  { %2696 = vmatprep.subr.bf16.mxu0 %v2996_v11 }
 0x169   :  { %2535 = vmatmul.mubr.msk.f32.gmra.mrb[8].mxu1 %vm40_vm0, %v317_v24 }
 0x16a   :  { %2537 = vmatprep.mubr.msk.f32.mxu1 %vm40_vm0, %v318_v29 }
 0x16d   :  { %2538 = vmatmul.mubr.msk.f32.gmra.mrb[10].mxu1 %vm40_vm0, %v319_v34 }
 0x16e   :  { %2540 = vmatprep.mubr.msk.f32.mxu1 %vm40_vm0, %v320_v35 }
 0x171   :  { %2541 = vmatmul.mubr.msk.f32.gmra.mrb[12].mxu1 %vm40_vm0, %v321_v40 }
 0x172   :  { %2543 = vmatprep.mubr.msk.f32.mxu1 %vm40_vm0, %v322_v41 }
 0x175   :  { %2544 = vmatmul.mubr.msk.f32.gmra.mrb[14].mxu1 %vm40_vm0, %v323_v43 }
 0x22c   :  { %v2524_v54 = vpop.f32.mrb[0].mxu1 }
 0x22d   :  { %v535_v55 = vmul.f32 1.442695, %v2524_v54  ;;  %v454_v56 = vpop.f32.mrb[1].mxu1 }
 0x22e   :  { %v533_v57 = vmul.f32 1.442695, %v454_v56 }
 0x22f   :  { %2791 = vpow2.f32 %v535_v55 }
 0x230   :  { %2793 = vpow2.f32 %v533_v57  ;;  %v2527_v58 = vpop.f32.mrb[2].mxu1 }
 0x231   :  { %v539_v59 = vmul.f32 1.442695, %v2527_v58  ;;  %v464_v60 = vpop.f32.mrb[3].mxu1 }
 0x232   :  { %v537_v61 = vmul.f32 1.442695, %v464_v60 }
 0x233   :  { %2795 = vpow2.f32 %v539_v59 }
 0x234   :  { %2797 = vpow2.f32 %v537_v61  ;;  %v2530_v62 = vpop.f32.mrb[4].mxu1 }
 0x235   :  { %v543_v63 = vmul.f32 1.442695, %v2530_v62  ;;  %v474_v0 = vpop.f32.mrb[5].mxu1 }
 0x236   :  { %v541_v1 = vmul.f32 1.442695, %v474_v0 }
 0x237   :  { %2799 = vpow2.f32 %v543_v63 }
 0x238   :  { %2801 = vpow2.f32 %v541_v1  ;;  %v2533_v2 = vpop.f32.mrb[6].mxu1 }
 0x239   :  { %v3107_v4 = vpop.eup %2791  ;;  %v547_v5 = vmul.f32 1.442695, %v2533_v2  ;;  %v484_v7 = vpop.f32.mrb[7].mxu1 }
 0x23a   :  { %v3109_v3 = vpop.eup %2793  ;;  %v572_v8 = vsel %vm40_vm0, %v3107_v4, 0.0  ;;  %v545_v9 = vmul.f32 1.442695, %v484_v7 }
 0x23b   :  { %v573_v10 = vrot.slane %v572_v8, 4  ;;  %v565_v12 = vsel %vm40_vm0, %v3109_v3, 0.0  ;;  %2803 = vpow2.f32 %v547_v5 }
 0x23c   :  { %v566_v14 = vrot.slane %v565_v12, 4  ;;  %2805 = vpow2.f32 %v545_v9  ;;  %v2536_v15 = vpop.f32.mrb[8].mxu1 }
 0x23d   :  { %v3115_v16 = vpop.eup %2795  ;;  %v574_v17 = vadd.f32 %v573_v10, %v572_v8  ;;  %v551_v18 = vmul.f32 1.442695, %v2536_v15  ;;  %v494_v6 = vpop.f32.mrb[9].mxu1 }
 0x23e   :  { %v3117_v20 = vpop.eup %2797  ;;  %v567_v21 = vadd.f32 %v566_v14, %v565_v12  ;;  %v586_v22 = vsel %vm40_vm0, %v3115_v16, 0.0  ;;  %v549_v24 = vmul.f32 1.442695, %v494_v6 }
 0x23f   :  { %v575_v29 = vrot.slane %v574_v17, 2  ;;  %v587_v30 = vrot.slane %v586_v22, 4  ;;  %v579_v31 = vsel %vm40_vm0, %v3117_v20, 0.0  ;;  %2807 = vpow2.f32 %v551_v18 }
 0x240   :  { %v568_v32 = vrot.slane %v567_v21, 2  ;;  %v580_v33 = vrot.slane %v579_v31, 4  ;;  %2809 = vpow2.f32 %v549_v24  ;;  %v2539_v34 = vpop.f32.mrb[10].mxu1 }
 0x241   :  { %v3123_v35 = vpop.eup %2799  ;;  %v576_v36 = vadd.f32 %v575_v29, %v574_v17  ;;  %v588_v37 = vadd.f32 %v587_v30, %v586_v22  ;;  %v555_v39 = vmul.f32 1.442695, %v2539_v34  ;;  %v504_v40 = vpop.f32.mrb[11].mxu1 }
 0x242   :  { %v3125_v41 = vpop.eup %2801  ;;  %v569_v42 = vadd.f32 %v568_v32, %v567_v21  ;;  %v581_v43 = vadd.f32 %v580_v33, %v579_v31  ;;  %v600_v46 = vsel %vm40_vm0, %v3123_v35, 0.0  ;;  %v553_v47 = vmul.f32 1.442695, %v504_v40 }
 0x243   :  { %v577_v48 = vrot.slane %v576_v36, 1  ;;  %v589_v49 = vrot.slane %v588_v37, 2  ;;  %v601_v50 = vrot.slane %v600_v46, 4  ;;  %v593_v51 = vsel %vm40_vm0, %v3125_v41, 0.0 }
 0x244   :  { %v570_v54 = vrot.slane %v569_v42, 1  ;;  %v582_v55 = vrot.slane %v581_v43, 2  ;;  %v594_v56 = vrot.slane %v593_v51, 4  ;;  %2811 = vpow2.f32 %v555_v39  ;;  %v2542_v57 = vpop.f32.mrb[12].mxu1 }
 0x245   :  { %v3131_v58 = vpop.eup %2803  ;;  %v578_v59 = vadd.f32 %v577_v48, %v576_v36  ;;  %v590_v60 = vadd.f32 %v589_v49, %v588_v37  ;;  %v602_v61 = vadd.f32 %v601_v50, %v600_v46  ;;  %2813 = vpow2.f32 %v553_v47  ;;  %v514_v62 = vpop.f32.mrb[13].mxu1 }
 0x246   :  { %v3133_v63 = vpop.eup %2805  ;;  %v571_v0 = vadd.f32 %v570_v54, %v569_v42  ;;  %v583_v1 = vadd.f32 %v582_v55, %v581_v43  ;;  %v595_v2 = vadd.f32 %v594_v56, %v593_v51  ;;  %v614_v5 = vsel %vm40_vm0, %v3131_v58, 0.0 }
 0x247   :  { %2815 = vrcp.f32 %v578_v59  ;;  %v591_v7 = vrot.slane %v590_v60, 1  ;;  %v603_v8 = vrot.slane %v602_v61, 2  ;;  %v615_v9 = vrot.slane %v614_v5, 4 }
 0x248   :  { %2817 = vrcp.f32 %v571_v0  ;;  %v584_v10 = vrot.slane %v583_v1, 1  ;;  %v596_v12 = vrot.slane %v595_v2, 2  ;;  %v607_v14 = vsel %vm40_vm0, %v3133_v63, 0.0  ;;  %v3139_v15 = vpop.f32.mrb[14].mxu1 }
 0x249   :  { %v3141_v17 = vpop.eup %2807  ;;  %v592_v18 = vadd.f32 %v591_v7, %v590_v60  ;;  %v604_v6 = vadd.f32 %v603_v8, %v602_v61  ;;  %v616_v21 = vadd.f32 %v615_v9, %v614_v5  ;;  %v608_v22 = vrot.slane %v607_v14, 4  ;;  %v3143_v24 = vpop.f32.mrb[15].mxu1 }
 0x24a   :  { %v3145_v29 = vpop.eup %2809  ;;  %v585_v30 = vadd.f32 %v584_v10, %v583_v1  ;;  %v597_v31 = vadd.f32 %v596_v12, %v595_v2  ;;  %v628_v32 = vsel %vm40_vm0, %v3141_v17, 0.0  ;;  %v559_v51 = vmul.f32 1.442695, %v2542_v57 }
 0x24b   :  { %2819 = vrcp.f32 %v592_v18  ;;  %v605_v33 = vrot.slane %v604_v6, 1  ;;  %v617_v34 = vrot.slane %v616_v21, 2  ;;  %v609_v36 = vadd.f32 %v608_v22, %v607_v14 }
 0x24c   :  { %2821 = vrcp.f32 %v585_v30  ;;  %v598_v37 = vrot.slane %v597_v31, 1  ;;  %v629_v39 = vrot.slane %v628_v32, 4  ;;  %v621_v40 = vsel %vm40_vm0, %v3145_v29, 0.0 }
 0x24d   :  { %v606_v42 = vadd.f32 %v605_v33, %v604_v6  ;;  %v618_v43 = vadd.f32 %v617_v34, %v616_v21  ;;  %v610_v46 = vrot.slane %v609_v36, 2  ;;  %v622_v47 = vrot.slane %v621_v40, 4 }
 0x24e   :  { %v3151_v48 = vpop.eup %2811  ;;  %v599_v49 = vadd.f32 %v598_v37, %v597_v31  ;;  %v630_v50 = vadd.f32 %v629_v39, %v628_v32  ;;  %v557_v54 = vmul.f32 1.442695, %v514_v62 }
 0x24f   :  { %v3153_v55 = vpop.eup %2813  ;;  %2823 = vrcp.f32 %v606_v42  ;;  %v619_v56 = vrot.slane %v618_v43, 1  ;;  %v611_v59 = vadd.f32 %v610_v46, %v609_v36  ;;  %v623_v60 = vadd.f32 %v622_v47, %v621_v40 }
 0x250   :  { %2825 = vrcp.f32 %v599_v49  ;;  %v631_v61 = vrot.slane %v630_v50, 2  ;;  %v642_v0 = vsel %vm40_vm0, %v3151_v48, 0.0  ;;  %v635_v1 = vsel %vm40_vm0, %v3153_v55, 0.0 }
 0x251   :  { %v2816_v2 = vpop.eup %2815  ;;  %v620_v5 = vadd.f32 %v619_v56, %v618_v43  ;;  %v612_v7 = vrot.slane %v611_v59, 1  ;;  %v624_v8 = vrot.slane %v623_v60, 2  ;;  %v643_v57 = vrot.slane %v642_v0, 4 }
 0x252   :  { %v2818_v62 = vpop.eup %2817  ;;  %v694_v9 = vmul.f32 %v2816_v2, %v3107_v4  ;;  %v632_v10 = vadd.f32 %v631_v61, %v630_v50  ;;  %v636_v12 = vrot.slane %v635_v1, 4  ;;  %2827 = vpow2.f32 %v559_v51 }
 0x253   :  { %v693_v14 = vmul.f32 %v2818_v62, %v3109_v3  ;;  %2829 = vrcp.f32 %v620_v5  ;;  %v613_v18 = vadd.f32 %v612_v7, %v611_v59  ;;  %v625_v6 = vadd.f32 %v624_v8, %v623_v60 }
 0x254   :  { %v716_v21 = vmul.f32 %v3093_v44, %v694_v9  ;;  %v633_v22 = vrot.slane %v632_v10, 1  ;;  %v644_v30 = vadd.f32 %v643_v57, %v642_v0  ;;  %2831 = vpow2.f32 %v557_v54 }
 0x255   :  { %v2820_v31 = vpop.eup %2819  ;;  %v715_v32 = vmul.f32 %v3093_v44, %v693_v14  ;;  %2833 = vrcp.f32 %v613_v18  ;;  %v626_v33 = vrot.slane %v625_v6, 1  ;;  %v637_v34 = vadd.f32 %v636_v12, %v635_v1 }
 0x256   :  { %v2822_v4 = vpop.eup %2821  ;;  %v738_v36 = vsel %vm40_vm0, %v716_v21, 0.0  ;;  %v696_v37 = vmul.f32 %v2820_v31, %v3115_v16  ;;  %v634_v3 = vadd.f32 %v633_v22, %v632_v10  ;;  %v645_v39 = vrot.slane %v644_v30, 2 }
 0x257   :  { %v739_v40 = vrot.slane %v738_v36, 4  ;;  %v731_v42 = vsel %vm40_vm0, %v715_v32, 0.0  ;;  %v695_v43 = vmul.f32 %v2822_v4, %v3117_v20  ;;  %v627_v46 = vadd.f32 %v626_v33, %v625_v6 }
 0x258   :  { %v732_v47 = vrot.slane %v731_v42, 4  ;;  %v718_v49 = vmul.f32 %v3093_v44, %v696_v37  ;;  %2835 = vrcp.f32 %v634_v3  ;;  %v646_v50 = vadd.f32 %v645_v39, %v644_v30 }
 0x259   :  { %v2824_v51 = vpop.eup %2823  ;;  %v740_v54 = vadd.f32 %v739_v40, %v738_v36  ;;  %v717_v56 = vmul.f32 %v3093_v44, %v695_v43  ;;  %2837 = vrcp.f32 %v627_v46  ;;  %v638_v59 = vrot.slane %v637_v34, 2 }
 0x25a   :  { %v2826_v16 = vpop.eup %2825  ;;  %v733_v60 = vadd.f32 %v732_v47, %v731_v42  ;;  %v752_v61 = vsel %vm40_vm0, %v718_v49, 0.0  ;;  %v698_v0 = vmul.f32 %v2824_v51, %v3123_v35  ;;  %v647_v1 = vrot.slane %v646_v50, 1 }
 0x25b   :  { %v741_v20 = vrot.slane %v740_v54, 2  ;;  %v753_v2 = vrot.slane %v752_v61, 4  ;;  %v745_v5 = vsel %vm40_vm0, %v717_v56, 0.0  ;;  %v697_v7 = vmul.f32 %v2826_v16, %v3125_v41 }
 0x25c   :  { %v3173_v8 = vpop.eup %2827  ;;  %v734_v57 = vrot.slane %v733_v60, 2  ;;  %v746_v62 = vrot.slane %v745_v5, 4  ;;  %v720_v9 = vmul.f32 %v3093_v44, %v698_v0  ;;  %v648_v10 = vadd.f32 %v647_v1, %v646_v50 }
 0x25d   :  { %v2830_v12 = vpop.eup %2829  ;;  %v742_v14 = vadd.f32 %v741_v20, %v740_v54  ;;  %v754_v18 = vadd.f32 %v753_v2, %v752_v61  ;;  %v719_v6 = vmul.f32 %v3093_v44, %v697_v7  ;;  %v639_v35 = vadd.f32 %v638_v59, %v637_v34 }
 0x25e   :  { %v3177_v21 = vpop.eup %2831  ;;  %v735_v22 = vadd.f32 %v734_v57, %v733_v60  ;;  %v747_v30 = vadd.f32 %v746_v62, %v745_v5  ;;  %v766_v31 = vsel %vm40_vm0, %v720_v9, 0.0  ;;  %v700_v41 = vmul.f32 %v2830_v12, %v3131_v58 }
 0x25f   :  { %v2834_v32 = vpop.eup %2833  ;;  %v743_v33 = vrot.slane %v742_v14, 1  ;;  %v755_v4 = vrot.slane %v754_v18, 2  ;;  %v759_v36 = vsel %vm40_vm0, %v719_v6, 0.0  ;;  %v563_v37 = vmul.f32 1.442695, %v3139_v15 }
 0x260   :  { %v736_v3 = vrot.slane %v735_v22, 1  ;;  %v748_v39 = vrot.slane %v747_v30, 2  ;;  %v767_v40 = vrot.slane %v766_v31, 4  ;;  %v760_v42 = vrot.slane %v759_v36, 4 }
 0x261   :  { %v3184_v34 = vmul.f32 %v3093_v44, %v700_v41  ;;  %v699_v43 = vmul.f32 %v2834_v32, %v3133_v63  ;;  %2839 = vrcp.f32 %v648_v10  ;;  %v640_v46 = vrot.slane %v639_v35, 1 }
 0x262   :  { %v2836_v47 = vpop.eup %2835  ;;  %v3187_v58 = vadd.f32 %v743_v33, %v742_v14  ;;  %v3189_v49 = vadd.f32 %v736_v3, %v735_v22  ;;  %v749_v50 = vadd.f32 %v748_v39, %v747_v30  ;;  %v656_v15 = vsel %vm40_vm0, %v3173_v8, 0.0 }
 0x263   :  { %v2838_v51 = vpop.eup %2837  ;;  %v761_v54 = vadd.f32 %v760_v42, %v759_v36  ;;  %v702_v56 = vmul.f32 %v2836_v47, %v3141_v17  ;;  %v641_v59 = vadd.f32 %v640_v46, %v639_v35  ;;  %v657_v16 = vrot.slane %v656_v15, 4 }
 0x264   :  { %v721_v60 = vmul.f32 %v3093_v44, %v699_v43  ;;  %v701_v63 = vmul.f32 %v2838_v51, %v3145_v29  ;;  %v649_v61 = vsel %vm40_vm0, %v3177_v21, 0.0  ;;  %2841 = vpow2.f32 %v563_v37 }
 0x265   :  { %v724_v0 = vmul.f32 %v3095_v45, %v702_v56  ;;  %2843 = vrcp.f32 %v641_v59  ;;  %v658_v1 = vadd.f32 %v657_v16, %v656_v15  ;;  %v650_v20 = vrot.slane %v649_v61, 4 }
 0x266   :  { %v750_v2 = vrot.slane %v749_v50, 1  ;;  %v723_v5 = vmul.f32 %v3095_v45, %v701_v63  ;;  %v561_v17 = vmul.f32 1.442695, %v3143_v24  ;;  %v756_v7 = vadd.f32 %v755_v4, %v754_v18 }
 0x267   :  { %v794_v57 = vsel %vm40_vm0, %v724_v0, 0.0  ;;  %v659_v44 = vrot.slane %v658_v1, 2  ;;  %v651_v62 = vadd.f32 %v650_v20, %v649_v61  ;;  %v762_v29 = vrot.slane %v761_v54, 2 }
 0x268   :  { %v795_v9 = vrot.slane %v794_v57, 4  ;;  %v787_v10 = vsel %vm40_vm0, %v723_v5, 0.0  ;;  %2845 = vpow2.f32 %v561_v17  ;;  %v757_v12 = vrot.slane %v756_v7, 1 }
 0x269   :  { %v788_v14 = vrot.slane %v787_v10, 4  ;;  %v660_v6 = vadd.f32 %v659_v44, %v658_v1  ;;  %v652_v35 = vrot.slane %v651_v62, 2  ;;  %v763_v22 = vadd.f32 %v762_v29, %v761_v54 }
 0x26a   :  { %v796_v30 = vadd.f32 %v795_v9, %v794_v57  ;;  %v751_v41 = vadd.f32 %v750_v2, %v749_v50  ;;  %v768_v32 = vadd.f32 %v767_v40, %v766_v31  ;;  %v773_v24 = vsel %vm40_vm0, %v721_v60, 0.0 }
 0x26b   :  { %v2840_v18 = vpop.eup %2839  ;;  %v789_v33 = vadd.f32 %v788_v14, %v787_v10  ;;  %v661_v4 = vrot.slane %v660_v6, 1  ;;  %v653_v36 = vadd.f32 %v652_v35, %v651_v62  ;;  %v3204_v37 = vadd.f32 %v757_v12, %v756_v7 }
 0x26c   :  { %v797_v3 = vrot.slane %v796_v30, 2  ;;  %v704_v39 = vmul.f32 %v2840_v18, %v3151_v48  ;;  %v769_v42 = vrot.slane %v768_v32, 2  ;;  %v774_v43 = vrot.slane %v773_v24, 4 }
 0x26d   :  { %v790_v46 = vrot.slane %v789_v33, 2  ;;  %v662_v47 = vadd.f32 %v661_v4, %v660_v6  ;;  %v654_v15 = vrot.slane %v653_v36, 1  ;;  %v764_v50 = vrot.slane %v763_v22, 1 }
 0x26e   :  { %v3207_v31 = vpop.eup %2841  ;;  %v798_v40 = vadd.f32 %v797_v3, %v796_v30  ;;  %v726_v51 = vmul.f32 %v3095_v45, %v704_v39  ;;  %v770_v54 = vadd.f32 %v769_v42, %v768_v32  ;;  %v775_v56 = vadd.f32 %v774_v43, %v773_v24 }
 0x26f   :  { %v2844_v59 = vpop.eup %2843  ;;  %v791_v16 = vadd.f32 %v790_v46, %v789_v33  ;;  %2847 = vrcp.f32 %v662_v47  ;;  %v655_v60 = vadd.f32 %v654_v15, %v653_v36  ;;  %v670_v48 = vsel %vm40_vm0, %v3207_v31, 0.0 }
 0x270   :  { %v799_v63 = vrot.slane %v798_v40, 1  ;;  %v808_v61 = vsel %vm40_vm0, %v726_v51, 0.0  ;;  %v703_v0 = vmul.f32 %v2844_v59, %v3153_v55  ;;  %v671_v1 = vrot.slane %v670_v48, 4 }
 0x271   :  { %v792_v20 = vrot.slane %v791_v16, 1  ;;  %v809_v2 = vrot.slane %v808_v61, 4  ;;  %2849 = vrcp.f32 %v655_v60  ;;  %v765_v5 = vadd.f32 %v764_v50, %v763_v22 }
 0x272   :  { %v3214_v17 = vpop.eup %2845  ;;  %v725_v7 = vmul.f32 %v3095_v45, %v703_v0  ;;  %v672_v57 = vadd.f32 %v671_v1, %v670_v48  ;;  %v771_v44 = vrot.slane %v770_v54, 1  ;;  %v776_v62 = vrot.slane %v775_v56, 2 }
 0x273   :  { %v800_v29 = vadd.f32 %v799_v63, %v798_v40  ;;  %v793_v9 = vadd.f32 %v792_v20, %v791_v16  ;;  %v810_v10 = vadd.f32 %v809_v2, %v808_v61  ;;  %v663_v12 = vsel %vm40_vm0, %v3214_v17, 0.0 }
 0x274   :  { %v801_v55 = vsel %vm40_vm0, %v725_v7, 0.0  ;;  %v673_v14 = vrot.slane %v672_v57, 2  ;;  %v664_v6 = vrot.slane %v663_v12, 4  ;;  %v777_v35 = vadd.f32 %v776_v62, %v775_v56 }
 0x275   :  { %v811_v30 = vrot.slane %v810_v10, 2  ;;  %v802_v22 = vrot.slane %v801_v55, 4  ;;  %v780_v32 = vsel %vm40_vm0, %v3184_v34, 0.0  ;;  %v864_v24 = vsel %vm863_vm1, %v3187_v58, %v3189_v49 }
 0x276   :  { %v674_v18 = vadd.f32 %v673_v14, %v672_v57  ;;  %v665_v33 = vadd.f32 %v664_v6, %v663_v12  ;;  %v778_v4 = vrot.slane %v777_v35, 1  ;;  %v781_v36 = vrot.slane %v780_v32, 4 }
 0x277   :  { %v812_v3 = vadd.f32 %v811_v30, %v810_v10  ;;  %v803_v39 = vadd.f32 %v802_v22, %v801_v55  ;;  %v866_v42 = vsel %vm865_vm2, %v751_v41, %v864_v24  ;;  %v877_v43 = vsel %vm863_vm1, %v800_v29, %v793_v9 }
 0x278   :  { %v675_v46 = vrot.slane %v674_v18, 1  ;;  %v666_v47 = vrot.slane %v665_v33, 2  ;;  %v782_v15 = vadd.f32 %v781_v36, %v780_v32  ;;  %v779_v40 = vadd.f32 %v778_v4, %v777_v35 }
 0x279   :  { %v2848_v50 = vpop.eup %2847  ;;  %v804_v34 = vrot.slane %v803_v39, 2  ;;  %v868_v58 = vsel %vm867_vm3, %v3204_v37, %v866_v42  ;;  %v813_v41 = vrot.slane %v812_v3, 1  ;;  %v772_v48 = vadd.f32 %v771_v44, %v770_v54 }
 0x27a   :  { %v706_v49 = vmul.f32 %v2848_v50, %v3173_v8  ;;  %v676_v51 = vadd.f32 %v675_v46, %v674_v18  ;;  %v667_v56 = vadd.f32 %v666_v47, %v665_v33  ;;  %v783_v59 = vrot.slane %v782_v15, 2 }
 0x27b   :  { %v2850_v16 = vpop.eup %2849  ;;  %v805_v60 = vadd.f32 %v804_v34, %v803_v39  ;;  %v870_v63 = vsel %vm869_vm4, %v765_v5, %v868_v58 }
 0x27c   :  { %v728_v61 = vmul.f32 %v3095_v45, %v706_v49  ;;  %v705_v0 = vmul.f32 %v2850_v16, %v3177_v21  ;;  %2851 = vrcp.f32 %v676_v51  ;;  %v668_v1 = vrot.slane %v667_v56, 1 }
 0x27d   :  { %v806_v20 = vrot.slane %v805_v60, 1  ;;  %v784_v37 = vadd.f32 %v783_v59, %v782_v15  ;;  %v872_v2 = vsel %vm871_vm5, %v772_v48, %v870_v63  ;;  %v814_v21 = vadd.f32 %v813_v41, %v812_v3 }
 0x27e   :  { %v822_v8 = vsel %vm40_vm0, %v728_v61, 0.0  ;;  %v727_v7 = vmul.f32 %v3095_v45, %v705_v0  ;;  %v669_v57 = vadd.f32 %v668_v1, %v667_v56  ;;  %v874_v62 = vsel %vm873_vm6, %v779_v40, %v872_v2 }
 0x27f   :  { %v807_v54 = vadd.f32 %v806_v20, %v805_v60  ;;  %v823_v44 = vrot.slane %v822_v8, 4  ;;  %v785_v5 = vrot.slane %v784_v37, 1  ;;  %v845_v0 = vsub.s32 1, %v3021_v25 }
 0x280   :  { %v815_v29 = vsel %vm40_vm0, %v727_v7, 0.0  ;;  %2853 = vrcp.f32 %v669_v57  ;;  %v2935_v7 = vld [vmem:[%s3617_s0 + $0x8] sm:$0xff] }
 0x281   :  { %v824_v9 = vadd.f32 %v823_v44, %v822_v8  ;;  %v816_v10 = vrot.slane %v815_v29, 4  ;;  %v786_v12 = vadd.f32 %v785_v5, %v784_v37  ;;  %v878_v55 = vsel %vm865_vm2, %v807_v54, %v877_v43 }
 0x282   :  { %v879_v14 = vsel %vm867_vm3, %v814_v21, %v878_v55  ;;  %v3258_v1 = vrot.slane %v3029_v27, %v845_v0 }
 0x283   :  { %v817_v6 = vadd.f32 %v816_v10, %v815_v29  ;;  %v876_v35 = vsel %vm875_vm7, %v786_v12, %v874_v62  ;;  %v825_v30 = vrot.slane %v824_v9, 2  ;;  %v2936_v62 = vld [vmem:[%s3617_s0] sm:$0xff]  ;;  %v1010_v29 = vsub.s32 2, %v3021_v25 }
 0x284   :  { %2554 = vmatprep.mubr.msk.f32.mxu0 %vm40_vm0, %v876_v35 }
 0x285   :  { %v818_v22 = vrot.slane %v817_v6, 2  ;;  %v826_v32 = vadd.f32 %v825_v30, %v824_v9  ;;  %v3272_v21 = vrot.slane %v3029_v27, %v1010_v29  ;;  %v27_v27 = vld [vmem:[%s3619_s2] sm:$0xff] }
 0x286   :  { %v2852_v24 = vpop.eup %2851 }
 0x287   :  { %v708_v18 = vmul.f32 %v2852_v24, %v3207_v31  ;;  %v819_v33 = vadd.f32 %v818_v22, %v817_v6  ;;  %v827_v4 = vrot.slane %v826_v32, 1 }
 0x289   :  { %v730_v36 = vmul.f32 %v3095_v45, %v708_v18  ;;  %v820_v3 = vrot.slane %v819_v33, 1  ;;  %v828_v47 = vadd.f32 %v827_v4, %v826_v32  ;;  %v28_v32 = vld [vmem:[%s3619_s2 + $0x8] sm:$0xff] }
 0x28a   :  { %v2854_v39 = vpop.eup %2853  ;;  %v3288_v24 = vpack.c.bf16 %v28_v32, %v27_v27 }
 0x28b   :  { %v707_v42 = vmul.f32 %v2854_v39, %v3214_v17  ;;  %v821_v43 = vadd.f32 %v820_v3, %v819_v33  ;;  %v836_v46 = vsel %vm40_vm0, %v730_v36, 0.0 }
 0x28c   :  { %v837_v15 = vrot.slane %v836_v46, 4 }
 0x28d   :  { %v729_v50 = vmul.f32 %v3095_v45, %v707_v42  ;;  %v880_v34 = vsel %vm869_vm4, %v821_v43, %v879_v14 }
 0x28e   :  { %v838_v40 = vadd.f32 %v837_v15, %v836_v46  ;;  %v881_v31 = vsel %vm871_vm5, %v828_v47, %v880_v34 }
 0x28f   :  { %v829_v58 = vsel %vm40_vm0, %v729_v50, 0.0 }
 0x290   :  { %v830_v49 = vrot.slane %v829_v58, 4  ;;  %v839_v51 = vrot.slane %v838_v40, 2 }
 0x292   :  { %v831_v56 = vadd.f32 %v830_v49, %v829_v58  ;;  %v840_v59 = vadd.f32 %v839_v51, %v838_v40  ;;  %v29_v40 = vld [vmem:[%s3619_s2 + $0x10] sm:$0xff] }
 0x294   :  { %v832_v16 = vrot.slane %v831_v56, 2  ;;  %v841_v41 = vrot.slane %v840_v59, 1 }
 0x296   :  { %v833_v17 = vadd.f32 %v832_v16, %v831_v56  ;;  %v842_v63 = vadd.f32 %v841_v41, %v840_v59  ;;  %v31_v56 = vld [vmem:[%s3619_s2 + $0x20] sm:$0xff]  ;;  %v32_v59 = vld [vmem:[%s3619_s2 + $0x28] sm:$0xff]  ;;  %v34_v41 = vld [vmem:[%s3619_s2 + $0x38] sm:$0xff] }
 0x297   :  { %v3315_v16 = vpack.c.bf16 %v32_v59, %v31_v56 }
 0x298   :  { %v834_v60 = vrot.slane %v833_v17, 1 }
 0x29a   :  { %v835_v48 = vadd.f32 %v834_v60, %v833_v17  ;;  %v33_v17 = vld [vmem:[%s3619_s2 + $0x30] sm:$0xff] }
 0x29b   :  { %v3325_v60 = vpack.c.bf16 %v34_v41, %v33_v17 }
 0x29c   :  { %v882_v61 = vsel %vm873_vm6, %v835_v48, %v881_v31  ;;  %v30_v31 = vld [vmem:[%s3619_s2 + $0x18] sm:$0xff] }
 0x29d   :  { %v883_v45 = vsel %vm875_vm7, %v842_v63, %v882_v61  ;;  %v3304_v51 = vpack.c.bf16 %v30_v31, %v29_v40 }
 0x29e   :  { %2555 = vmatmul.mubr.msk.f32.vlgmr.msra.gmra.mrb[2].mxu0 %vm40_vm0, %v883_v45 }
 0x29f   :  { %2698 = vmatpush3.bf16.msra.mxu0 %v2996_v11 }
 0x2a0   :  { %2700 = vmatprep.subr.bf16.mxu0 %v3002_v13 }
 0x2a3   :  { %2702 = vmatpush3.bf16.msra.mxu0 %v3002_v13 }
 0x2a4   :  { %2704 = vmatprep.subr.bf16.mxu0 %v3288_v24 }
 0x371   :  { %v2556_v20 = vpop.f32.mrb[2].mxu0 }
 0x372   :  { %v976_v37 = vadd.f32 %v2556_v20, %v3258_v1  ;;  %v970_v2 = vpop.f32.mrb[3].mxu0 }
 0x373   :  { %v971_v8 = vadd.f32 %v970_v2, %v3258_v1 }
 0x374   :  { %v980_v57 = vadd.f32 %v2935_v7, %v976_v37 }
 0x375   :  { %v979_v54 = vadd.f32 %v2936_v62, %v971_v8 }
 0x376   :  { %v984_v44 = vsel %vm40_vm0, %v980_v57, 0.0 }
 0x377   :  { %985 = vadd.xlane.f32.xlu1 %v984_v44  ;;  %v981_v5 = vsel %vm40_vm0, %v979_v54, 0.0 }
 0x378   :  { %982 = vadd.xlane.f32.xlu0 %v981_v5 }
 0x388   :  { %1015 = vrot.lane.b32.xlu1 %v3272_v21, %s2938_s11 }
 0x38c   :  { %1107 = vrot.lane.b32.xlu1 %v3258_v1, %s2939_s3 }
 0x404   :  { %v986_v9 = vpop.xlane.xlu1 %985 }
 0x405   :  { %v989_v10 = vmul.f32 0.03125, %v986_v9  ;;  %v983_v12 = vpop.xlane.xlu0 %982 }
 0x406   :  { %v988_v55 = vmul.f32 0.03125, %v983_v12 }
 0x407   :  { %v991_v14 = vsub.f32 %v980_v57, %v989_v10 }
 0x408   :  { %v990_v6 = vsub.f32 %v979_v54, %v988_v55  ;;  %v3291_v46 = vpop.permute.xlu1 %1015 }
 0x409   :  { %v993_v22 = vmul.f32 %v991_v14, %v991_v14 }
 0x40a   :  { %v992_v35 = vmul.f32 %v990_v6, %v990_v6 }
 0x40b   :  { %v997_v25 = vsel %vm40_vm0, %v993_v22, 0.0 }
 0x40c   :  { %v994_v30 = vsel %vm40_vm0, %v992_v35, 0.0  ;;  %v3340_v2 = vpop.permute.xlu1 %1107 }
 0x40d   :  { %995 = vadd.xlane.f32.xlu0 %v994_v30 }
 0x411   :  { %998 = vadd.xlane.f32.xlu0 %v997_v25 }
 0x427   :  { %1021 = vrot.lane.b32.xlu0 %v3258_v1, %s2938_s11 }
 0x49a   :  { %v996_v18 = vpop.xlane.xlu0 %995 }
 0x49b   :  { %v1000_v33 = vmul.f32 0.03125, %v996_v18 }
 0x49d   :  { %v1002_v4 = vadd.f32 1e-05, %v1000_v33 }
 0x49e   :  { %v999_v36 = vpop.xlane.xlu0 %998 }
 0x49f   :  { %2855 = vrsqrt.f32 %v1002_v4  ;;  %v1001_v3 = vmul.f32 0.03125, %v999_v36 }
 0x4a1   :  { %v1003_v39 = vadd.f32 1e-05, %v1001_v3 }
 0x4a2   :  { %v3331_v48 = vpop.permute.xlu0 %1021 }
 0x4a3   :  { %2857 = vrsqrt.f32 %v1003_v39 }
 0x4a9   :  { %v2856_v42 = vpop.eup %2855 }
 0x4aa   :  { %v1006_v43 = vmul.f32 %v2856_v42, %v990_v6 }
 0x4ac   :  { %v1012_v47 = vmul.f32 %v3272_v21, %v1006_v43 }
 0x4ad   :  { %v2858_v15 = vpop.eup %2857 }
 0x4ae   :  { %v1007_v50 = vmul.f32 %v2858_v15, %v991_v14  ;;  %v1018_v34 = vadd.f32 %v3291_v46, %v1012_v47 }
 0x4b0   :  { %v1013_v58 = vmul.f32 %v3272_v21, %v1007_v50  ;;  %2565 = vmatprep.mubr.msk.f32.mxu0 %vm40_vm0, %v1018_v34 }
 0x4b2   :  { %v1019_v49 = vadd.f32 %v3291_v46, %v1013_v58 }
 0x4b4   :  { %2566 = vmatmul.mubr.msk.f32.vlgmr.msra.gmra.mrb[4].mxu0 %vm40_vm0, %v1019_v49 }
 0x4b5   :  { %2706 = vmatpush3.bf16.msra.mxu0 %v3288_v24 }
 0x4b6   :  { %2708 = vmatprep.subr.bf16.mxu0 %v3304_v51 }
 0x4b9   :  { %2710 = vmatpush3.bf16.msra.mxu0 %v3304_v51 }
 0x4ba   :  { %2712 = vmatprep.subr.bf16.mxu0 %v3315_v16 }
 0x4bd   :  { %2714 = vmatpush3.bf16.msra.mxu0 %v3315_v16 }
 0x4be   :  { %2716 = vmatprep.subr.bf16.mxu0 %v3325_v60 }
 0x4c1   :  { %2718 = vmatpush3.bf16.msra.mxu0 %v3325_v60 }
 0x4c2   :  { %2728 = vmatprep.subr.bf16.mxu0 %v3012_v19 }
 0x587   :  { %v2567_v63 = vpop.f32.mrb[4].mxu0 }
 0x588   :  { %v1102_v61 = vadd.f32 %v2567_v63, %v3331_v48  ;;  %v1096_v45 = vpop.f32.mrb[5].mxu0 }
 0x589   :  { %v1097_v0 = vadd.f32 %v1096_v45, %v3331_v48 }
 0x58a   :  { %v1106_v37 = vmax.f32 %v1102_v61, 0.0 }
 0x58b   :  { %v1105_v20 = vmax.f32 %v1097_v0, 0.0 }
 0x58d   :  { %2584 = vmatprep.mubr.msk.f32.mxu0 %vm1110_vm8, %v1105_v20 }
 0x58e   :  { %2585 = vmatmul.mubr.msk.f32.vlgmr.msra.gmra.mrb[6].mxu0 %vm1110_vm8, %v1106_v37 }
 0x58f   :  { %2730 = vmatpush3.bf16.msra.mxu0 %v3012_v19 }
 0x590   :  { %2732 = vmatprep.subr.bf16.mxu0 %v3016_v23 }
 0x593   :  { %2734 = vmatpush3.bf16.msra.mxu0 %v3016_v23 }
 0x661   :  { %v2586_v8 = vpop.f32.mrb[6].mxu0 }
 0x662   :  { %v1189_v7 = vadd.f32 %v2586_v8, %v3340_v2  ;;  %v1183_v57 = vpop.f32.mrb[7].mxu0 }
 0x663   :  { %v1184_v62 = vadd.f32 %v1183_v57, %v3340_v2 }
 0x664   :  { %v1193_v54 = vadd.f32 %v1189_v7, %v1019_v49 }
 0x665   :  { %v1192_v44 = vadd.f32 %v1184_v62, %v1018_v34 }
 0x666   :  { %v1197_v5 = vsel %vm40_vm0, %v1193_v54, 0.0 }
 0x667   :  { %1198 = vadd.xlane.f32.xlu0 %v1197_v5  ;;  %v1194_v29 = vsel %vm40_vm0, %v1192_v44, 0.0 }
 0x668   :  { %1195 = vadd.xlane.f32.xlu1 %v1194_v29 }
 0x6f4   :  { %v1199_v19 = vpop.xlane.xlu0 %1198 }
 0x6f5   :  { %v1201_v9 = vmul.f32 0.03125, %v1199_v19  ;;  %v1196_v10 = vpop.xlane.xlu1 %1195 }
 0x6f6   :  { %v1200_v23 = vmul.f32 0.03125, %v1196_v10 }
 0x6f7   :  { %v1203_v12 = vsub.f32 %v1193_v54, %v1201_v9 }
 0x6f8   :  { %v1202_v55 = vsub.f32 %v1192_v44, %v1200_v23 }
 0x6f9   :  { %v1205_v14 = vmul.f32 %v1203_v12, %v1203_v12 }
 0x6fa   :  { %v1204_v6 = vmul.f32 %v1202_v55, %v1202_v55 }
 0x6fb   :  { %v1209_v35 = vsel %vm40_vm0, %v1205_v14, 0.0 }
 0x6fc   :  { %1210 = vadd.xlane.f32.xlu1 %v1209_v35  ;;  %v1206_v30 = vsel %vm40_vm0, %v1204_v6, 0.0 }
 0x6fd   :  { %1207 = vadd.xlane.f32.xlu0 %v1206_v30 }
 0x70d   :  { %1225 = vrot.lane.b32.xlu1 %v3272_v21, %s2939_s3 }
 0x713   :  { %1220 = vrot.lane.b32.xlu0 %v3272_v21, %s2937_s7 }
 0x789   :  { %v1211_v22 = vpop.xlane.xlu1 %1210 }
 0x78a   :  { %v1213_v25 = vmul.f32 0.03125, %v1211_v22  ;;  %v1208_v27 = vpop.xlane.xlu0 %1207 }
 0x78b   :  { %v1212_v32 = vmul.f32 0.03125, %v1208_v27 }
 0x78c   :  { %v1215_v18 = vadd.f32 1e-05, %v1213_v25 }
 0x78d   :  { %v1214_v33 = vadd.f32 1e-05, %v1212_v32  ;;  %v3355_v47 = vpop.permute.xlu1 %1225 }
 0x78e   :  { %2859 = vrsqrt.f32 %v1215_v18  ;;  %v3352_v36 = vpop.permute.xlu0 %1220 }
 0x78f   :  { %2861 = vrsqrt.f32 %v1214_v33 }
 0x798   :  { %v2860_v4 = vpop.eup %2859 }
 0x799   :  { %v2862_v3 = vpop.eup %2861  ;;  %v1219_v39 = vmul.f32 %v2860_v4, %v1203_v12 }
 0x79a   :  { %v1218_v42 = vmul.f32 %v2862_v3, %v1202_v55 }
 0x79b   :  { %v1224_v43 = vmul.f32 %v3352_v36, %v1219_v39 }
 0x79c   :  { %v1223_v15 = vmul.f32 %v3352_v36, %v1218_v42 }
 0x79d   :  { %v3362_v34 = vadd.f32 %v3355_v47, %v1224_v43 }
 0x79e   :  { %v3359_v50 = vadd.f32 %v3355_v47, %v1223_v15 }
 0x7a0   :  { %2595 = vmatprep.mubr.msk.f32.mxu1 %vm40_vm0, %v3359_v50 }
 0x7a1   :  { %2596 = vmatmul.mubr.msk.f32.vlgmr.msra.gmra.mrb[16].mxu1 %vm40_vm0, %v3362_v34 }
 0x7a2   :  { %2738 = vmatpush3.bf16.msra.mxu1 %v3097_v52 }
 0x7a3   :  { %2740 = vmatprep.subr.bf16.mxu1 %v3099_v53 }
 0x7a6   :  { %2742 = vmatpush3.bf16.msra.mxu1 %v3099_v53 }
 0x7a7   :  { %2744 = vmatprep.subr.bf16.mxu1 %v2996_v11 }
 0x874   :  { %v2597_v40 = vpop.f32.mrb[16].mxu1 }
 0x875   :  { %v1308_v31 = vadd.f32 %v2597_v40, %v3033_v28  ;;  %v1302_v58 = vpop.f32.mrb[17].mxu1 }
 0x876   :  { %v1303_v49 = vadd.f32 %v1302_v58, %v3033_v28 }
 0x877   :  { %1493 = vrot.lane.b32.xlu0 %v1308_v31, %s2938_s11  ;;  %v1369_v54 = vrot.slane %v1308_v31, %v3044_v38  ;;  %v1362_v23 = vcombine.high %v1308_v31, %v1308_v31 }
 0x878   :  { %1491 = vrot.lane.b32.xlu1 %v1303_v49, %s2938_s11  ;;  %v1320_v52 = vrot.slane %v1303_v49, %v3044_v38  ;;  %v1313_v53 = vcombine.high %v1303_v49, %v1303_v49 }
 0x879   :  { %v1377_v12 = vcombine.high %v1369_v54, %v1369_v54  ;;  %v1385_v6 = vrot.slane %v1369_v54, %v3044_v38  ;;  %v1376_v25 = vrot.slane %v1362_v23, %v3044_v38 }
 0x87a   :  { %v1328_v56 = vcombine.high %v1320_v52, %v1320_v52  ;;  %v1336_v59 = vrot.slane %v1320_v52, %v3044_v38  ;;  %v1327_v41 = vrot.slane %v1313_v53, %v3044_v38 }
 0x87b   :  { %1884 = vrot.lane.b32.xlu0 %v1308_v31, %s2937_s7  ;;  %v1399_v18 = vrot.slane %v1377_v12, %v3044_v38  ;;  %v1446_v33 = vrot.slane %v1385_v6, %v3024_v26  ;;  %v1407_v4 = vcombine.high %v1385_v6, %v1385_v6  ;;  %v1378_v42 = vcombine.high %v1376_v25, %v1376_v25 }
 0x87c   :  { %1882 = vrot.lane.b32.xlu1 %v1303_v49, %s2937_s7  ;;  %v1350_v17 = vrot.slane %v1328_v56, %v3044_v38  ;;  %v1358_v63 = vcombine.high %v1336_v59, %v1336_v59  ;;  %v1414_v28 = vrot.slane %v1336_v59, %v3024_v26  ;;  %v1329_v45 = vcombine.high %v1327_v41, %v1327_v41 }
 0x87d   :  { %v1343_v57 = vrot.slane %v1327_v41, %v3044_v38  ;;  %v1450_v43 = vrot.slane %v1399_v18, %v3024_v26  ;;  %v1409_v15 = vcombine.high %v1399_v18, %v1399_v18  ;;  %v1454_v40 = vrot.slane %v1407_v4, %v3024_v26 }
 0x87e   :  { %v1418_v61 = vrot.slane %v1350_v17, %v3024_v26  ;;  %v1360_v20 = vcombine.high %v1350_v17, %v1350_v17  ;;  %v1422_v7 = vrot.slane %v1358_v63, %v3024_v26  ;;  %v1357_v5 = vrot.slane %v1329_v45, %v3044_v38 }
 0x87f   :  { %v1430_v29 = vrot.slane %v1343_v57, %v3024_v26  ;;  %v1359_v19 = vcombine.high %v1343_v57, %v1343_v57  ;;  %v1392_v31 = vrot.slane %v1376_v25, %v3044_v38  ;;  %v1458_v52 = vrot.slane %v1409_v15, %v3024_v26 }
 0x880   :  { %v1426_v44 = vrot.slane %v1360_v20, %v3024_v26  ;;  %v1434_v55 = vrot.slane %v1357_v5, %v3024_v26  ;;  %v1361_v14 = vcombine.high %v1357_v5, %v1357_v5  ;;  %v1406_v56 = vrot.slane %v1378_v42, %v3044_v38 }
 0x881   :  { %v1438_v35 = vrot.slane %v1359_v19, %v3024_v26  ;;  %v1462_v53 = vrot.slane %v1392_v31, %v3024_v26  ;;  %v1408_v59 = vcombine.high %v1392_v31, %v1392_v31 }
 0x882   :  { %v1442_v32 = vrot.slane %v1361_v14, %v3024_v26  ;;  %v1466_v63 = vrot.slane %v1406_v56, %v3024_v26 }
 0x8e9   :  { %v1494_v27 = vpop.permute.xlu0 %1493 }
 0x8ea   :  { %v1492_v0 = vpop.permute.xlu1 %1491  ;;  %v1505_v39 = vmul.f32 %v1494_v27, %v1446_v33  ;;  %v1506_v58 = vmul.f32 %v1494_v27, %v1450_v43  ;;  %v1507_v49 = vmul.f32 %v1494_v27, %v1454_v40  ;;  %v1508_v17 = vmul.f32 %v1494_v27, %v1458_v52 }
 0x8eb   :  { %v1497_v37 = vmul.f32 %v1492_v0, %v1414_v28  ;;  %v1498_v8 = vmul.f32 %v1492_v0, %v1418_v61  ;;  %v1499_v62 = vmul.f32 %v1492_v0, %v1422_v7  ;;  %v1500_v9 = vmul.f32 %v1492_v0, %v1426_v44 }
 0x8ec   :  { %v1501_v10 = vmul.f32 %v1492_v0, %v1430_v29  ;;  %v1502_v30 = vmul.f32 %v1492_v0, %v1434_v55  ;;  %v1503_v22 = vmul.f32 %v1492_v0, %v1438_v35  ;;  %v1504_v3 = vmul.f32 %v1492_v0, %v1442_v32 }
 0x8ed   :  { %2606 = vmatprep.mubr.msk.f32.mxu0 %vm40_vm0, %v1497_v37  ;;  %v1509_v41 = vmul.f32 %v1494_v27, %v1462_v53  ;;  %v1410_v28 = vcombine.high %v1406_v56, %v1406_v56  ;;  %v1470_v61 = vrot.slane %v1408_v59, %v3024_v26  ;;  %v1510_v45 = vmul.f32 %v1494_v27, %v1466_v63 }
 0x8ee   :  { %2607 = vmatmul.mubr.msk.f32.vlgmr.msra.gmra.mrb[8].mxu0 %vm40_vm0, %v1498_v8 }
 0x8ef   :  { %2609 = vmatprep.mubr.msk.f32.mxu0 %vm40_vm0, %v1499_v62  ;;  %v1511_v0 = vmul.f32 %v1494_v27, %v1470_v61  ;;  %v1474_v38 = vrot.slane %v1410_v28, %v3024_v26 }
 0x8f1   :  { %v1512_v20 = vmul.f32 %v1494_v27, %v1474_v38 }
 0x8f2   :  { %2610 = vmatmul.mubr.msk.f32.gmra.mrb[10].mxu0 %vm40_vm0, %v1500_v9 }
 0x8f3   :  { %2612 = vmatprep.mubr.msk.f32.mxu0 %vm40_vm0, %v1501_v10 }
 0x8f6   :  { %2613 = vmatmul.mubr.msk.f32.gmra.mrb[12].mxu0 %vm40_vm0, %v1502_v30 }
 0x8f7   :  { %2615 = vmatprep.mubr.msk.f32.mxu0 %vm40_vm0, %v1503_v22 }
 0x8fa   :  { %2616 = vmatmul.mubr.msk.f32.gmra.mrb[14].mxu0 %vm40_vm0, %v1504_v3 }
 0x8fb   :  { %2618 = vmatprep.mubr.msk.f32.mxu0 %vm40_vm0, %v1505_v39 }
 0x8fe   :  { %2619 = vmatmul.mubr.msk.f32.gmra.mrb[16].mxu0 %vm40_vm0, %v1506_v58 }
 0x8ff   :  { %2621 = vmatprep.mubr.msk.f32.mxu0 %vm40_vm0, %v1507_v49 }
 0x902   :  { %2622 = vmatmul.mubr.msk.f32.gmra.mrb[18].mxu0 %vm40_vm0, %v1508_v17 }
 0x903   :  { %2624 = vmatprep.mubr.msk.f32.mxu0 %vm40_vm0, %v1509_v41 }
 0x906   :  { %2625 = vmatmul.mubr.msk.f32.gmra.mrb[20].mxu0 %vm40_vm0, %v1510_v45 }
 0x907   :  { %2627 = vmatprep.mubr.msk.f32.mxu0 %vm40_vm0, %v1511_v0 }
 0x90a   :  { %2628 = vmatmul.mubr.msk.f32.gmra.mrb[22].mxu0 %vm40_vm0, %v1512_v20 }
 0x9c1   :  { %v2608_v37 = vpop.f32.mrb[8].mxu0 }
 0x9c2   :  { %v1708_v8 = vmul.f32 1.442695, %v2608_v37  ;;  %v1627_v7 = vpop.f32.mrb[9].mxu0 }
 0x9c3   :  { %v1706_v57 = vmul.f32 1.442695, %v1627_v7 }
 0x9c4   :  { %2863 = vpow2.f32 %v1708_v8 }
 0x9c5   :  { %2865 = vpow2.f32 %v1706_v57  ;;  %v2611_v62 = vpop.f32.mrb[10].mxu0 }
 0x9c6   :  { %v1712_v54 = vmul.f32 1.442695, %v2611_v62  ;;  %v1637_v44 = vpop.f32.mrb[11].mxu0 }
 0x9c7   :  { %v1710_v5 = vmul.f32 1.442695, %v1637_v44 }
 0x9c8   :  { %2867 = vpow2.f32 %v1712_v54 }
 0x9c9   :  { %2869 = vpow2.f32 %v1710_v5  ;;  %v2614_v29 = vpop.f32.mrb[12].mxu0 }
 0x9ca   :  { %v1716_v19 = vmul.f32 1.442695, %v2614_v29  ;;  %v1647_v26 = vpop.f32.mrb[13].mxu0 }
 0x9cb   :  { %v1714_v9 = vmul.f32 1.442695, %v1647_v26 }
 0x9cc   :  { %2871 = vpow2.f32 %v1716_v19 }
 0x9cd   :  { %2873 = vpow2.f32 %v1714_v9  ;;  %v2617_v10 = vpop.f32.mrb[14].mxu0 }
 0x9ce   :  { %v3422_v23 = vpop.eup %2863  ;;  %v1720_v12 = vmul.f32 1.442695, %v2617_v10  ;;  %v1657_v55 = vpop.f32.mrb[15].mxu0 }
 0x9cf   :  { %v3424_v14 = vpop.eup %2865  ;;  %v1745_v6 = vsel %vm40_vm0, %v3422_v23, 0.0  ;;  %v1718_v35 = vmul.f32 1.442695, %v1657_v55 }
 0x9d0   :  { %v1746_v30 = vrot.slane %v1745_v6, 4  ;;  %v1738_v22 = vsel %vm40_vm0, %v3424_v14, 0.0  ;;  %2875 = vpow2.f32 %v1720_v12 }
 0x9d1   :  { %v1739_v25 = vrot.slane %v1738_v22, 4  ;;  %2877 = vpow2.f32 %v1718_v35  ;;  %v2620_v27 = vpop.f32.mrb[16].mxu0 }
 0x9d2   :  { %v3430_v32 = vpop.eup %2867  ;;  %v1747_v18 = vadd.f32 %v1746_v30, %v1745_v6  ;;  %v1724_v33 = vmul.f32 1.442695, %v2620_v27  ;;  %v1667_v4 = vpop.f32.mrb[17].mxu0 }
 0x9d3   :  { %v3432_v3 = vpop.eup %2869  ;;  %v1740_v39 = vadd.f32 %v1739_v25, %v1738_v22  ;;  %v1759_v42 = vsel %vm40_vm0, %v3430_v32, 0.0  ;;  %v1722_v43 = vmul.f32 1.442695, %v1667_v4 }
 0x9d4   :  { %v1748_v15 = vrot.slane %v1747_v18, 2  ;;  %v1760_v40 = vrot.slane %v1759_v42, 4  ;;  %v1752_v31 = vsel %vm40_vm0, %v3432_v3, 0.0  ;;  %2879 = vpow2.f32 %v1724_v33 }
 0x9d5   :  { %v1741_v58 = vrot.slane %v1740_v39, 2  ;;  %v1753_v49 = vrot.slane %v1752_v31, 4  ;;  %2881 = vpow2.f32 %v1722_v43  ;;  %v2623_v52 = vpop.f32.mrb[18].mxu0 }
 0x9d6   :  { %v3438_v56 = vpop.eup %2871  ;;  %v1749_v53 = vadd.f32 %v1748_v15, %v1747_v18  ;;  %v1761_v59 = vadd.f32 %v1760_v40, %v1759_v42  ;;  %v1728_v17 = vmul.f32 1.442695, %v2623_v52  ;;  %v1677_v41 = vpop.f32.mrb[19].mxu0 }
 0x9d7   :  { %v3440_v63 = vpop.eup %2873  ;;  %v1742_v28 = vadd.f32 %v1741_v58, %v1740_v39  ;;  %v1754_v61 = vadd.f32 %v1753_v49, %v1752_v31  ;;  %v1773_v45 = vsel %vm40_vm0, %v3438_v56, 0.0  ;;  %v1726_v0 = vmul.f32 1.442695, %v1677_v41 }
 0x9d8   :  { %v1750_v38 = vrot.slane %v1749_v53, 1  ;;  %v1762_v20 = vrot.slane %v1761_v59, 2  ;;  %v1774_v37 = vrot.slane %v1773_v45, 4  ;;  %v1766_v8 = vsel %vm40_vm0, %v3440_v63, 0.0 }
 0x9d9   :  { %v1743_v7 = vrot.slane %v1742_v28, 1  ;;  %v1755_v57 = vrot.slane %v1754_v61, 2  ;;  %v1767_v62 = vrot.slane %v1766_v8, 4  ;;  %2883 = vpow2.f32 %v1728_v17  ;;  %v2626_v54 = vpop.f32.mrb[20].mxu0 }
 0x9da   :  { %v3446_v44 = vpop.eup %2875  ;;  %v1751_v5 = vadd.f32 %v1750_v38, %v1749_v53  ;;  %v1763_v29 = vadd.f32 %v1762_v20, %v1761_v59  ;;  %v1775_v19 = vadd.f32 %v1774_v37, %v1773_v45  ;;  %2885 = vpow2.f32 %v1726_v0  ;;  %v1687_v26 = vpop.f32.mrb[21].mxu0 }
 0x9db   :  { %v3448_v9 = vpop.eup %2877  ;;  %v1744_v10 = vadd.f32 %v1743_v7, %v1742_v28  ;;  %v1756_v12 = vadd.f32 %v1755_v57, %v1754_v61  ;;  %v1768_v55 = vadd.f32 %v1767_v62, %v1766_v8  ;;  %v1787_v6 = vsel %vm40_vm0, %v3446_v44, 0.0 }
 0x9dc   :  { %2887 = vrcp.f32 %v1751_v5  ;;  %v1764_v35 = vrot.slane %v1763_v29, 1  ;;  %v1776_v30 = vrot.slane %v1775_v19, 2  ;;  %v1788_v22 = vrot.slane %v1787_v6, 4 }
 0x9dd   :  { %2889 = vrcp.f32 %v1744_v10  ;;  %v1757_v25 = vrot.slane %v1756_v12, 1  ;;  %v1769_v27 = vrot.slane %v1768_v55, 2  ;;  %v1780_v18 = vsel %vm40_vm0, %v3448_v9, 0.0  ;;  %v3454_v33 = vpop.f32.mrb[22].mxu0 }
 0x9de   :  { %v3456_v4 = vpop.eup %2879  ;;  %v1765_v39 = vadd.f32 %v1764_v35, %v1763_v29  ;;  %v1777_v42 = vadd.f32 %v1776_v30, %v1775_v19  ;;  %v1789_v43 = vadd.f32 %v1788_v22, %v1787_v6  ;;  %v1781_v15 = vrot.slane %v1780_v18, 4  ;;  %v3458_v40 = vpop.f32.mrb[23].mxu0 }
 0x9df   :  { %v3460_v31 = vpop.eup %2881  ;;  %v1758_v58 = vadd.f32 %v1757_v25, %v1756_v12  ;;  %v1770_v49 = vadd.f32 %v1769_v27, %v1768_v55  ;;  %v1801_v52 = vsel %vm40_vm0, %v3456_v4, 0.0  ;;  %v1732_v57 = vmul.f32 1.442695, %v2626_v54 }
 0x9e0   :  { %2891 = vrcp.f32 %v1765_v39  ;;  %v1778_v53 = vrot.slane %v1777_v42, 1  ;;  %v1790_v59 = vrot.slane %v1789_v43, 2  ;;  %v1782_v17 = vadd.f32 %v1781_v15, %v1780_v18 }
 0x9e1   :  { %2893 = vrcp.f32 %v1758_v58  ;;  %v1771_v41 = vrot.slane %v1770_v49, 1  ;;  %v1802_v28 = vrot.slane %v1801_v52, 4  ;;  %v1794_v61 = vsel %vm40_vm0, %v3460_v31, 0.0 }
 0x9e2   :  { %v1779_v45 = vadd.f32 %v1778_v53, %v1777_v42  ;;  %v1791_v0 = vadd.f32 %v1790_v59, %v1789_v43  ;;  %v1783_v38 = vrot.slane %v1782_v17, 2  ;;  %v1795_v20 = vrot.slane %v1794_v61, 4  ;;  %v3475_v42 = vpop.permute.xlu1 %1882 }
 0x9e3   :  { %v3466_v37 = vpop.eup %2883  ;;  %v1772_v8 = vadd.f32 %v1771_v41, %v1770_v49  ;;  %v1803_v7 = vadd.f32 %v1802_v28, %v1801_v52  ;;  %v1730_v62 = vmul.f32 1.442695, %v1687_v26 }
 0x9e4   :  { %v3468_v5 = vpop.eup %2885  ;;  %2895 = vrcp.f32 %v1779_v45  ;;  %v1792_v29 = vrot.slane %v1791_v0, 1  ;;  %v1784_v19 = vadd.f32 %v1783_v38, %v1782_v17  ;;  %v1796_v10 = vadd.f32 %v1795_v20, %v1794_v61 }
 0x9e5   :  { %2897 = vrcp.f32 %v1772_v8  ;;  %v1804_v12 = vrot.slane %v1803_v7, 2  ;;  %v1815_v55 = vsel %vm40_vm0, %v3466_v37, 0.0  ;;  %v1808_v6 = vsel %vm40_vm0, %v3468_v5, 0.0 }
 0x9e6   :  { %v2888_v35 = vpop.eup %2887  ;;  %v1793_v30 = vadd.f32 %v1792_v29, %v1791_v0  ;;  %v1785_v22 = vrot.slane %v1784_v19, 1  ;;  %v1797_v25 = vrot.slane %v1796_v10, 2  ;;  %v1816_v54 = vrot.slane %v1815_v55, 4 }
 0x9e7   :  { %v2890_v26 = vpop.eup %2889  ;;  %v1867_v27 = vmul.f32 %v2888_v35, %v3422_v23  ;;  %v1805_v18 = vadd.f32 %v1804_v12, %v1803_v7  ;;  %v1809_v39 = vrot.slane %v1808_v6, 4  ;;  %2899 = vpow2.f32 %v1732_v57 }
 0x9e8   :  { %v1866_v43 = vmul.f32 %v2890_v26, %v3424_v14  ;;  %2901 = vrcp.f32 %v1793_v30  ;;  %v1786_v15 = vadd.f32 %v1785_v22, %v1784_v19  ;;  %v1798_v58 = vadd.f32 %v1797_v25, %v1796_v10 }
 0x9e9   :  { %v1889_v49 = vmul.f32 %v3475_v42, %v1867_v27  ;;  %v1806_v52 = vrot.slane %v1805_v18, 1  ;;  %v1817_v53 = vadd.f32 %v1816_v54, %v1815_v55  ;;  %2903 = vpow2.f32 %v1730_v62 }
 0x9ea   :  { %v2892_v59 = vpop.eup %2891  ;;  %v1888_v17 = vmul.f32 %v3475_v42, %v1866_v43  ;;  %2905 = vrcp.f32 %v1786_v15  ;;  %v1799_v23 = vrot.slane %v1798_v58, 1  ;;  %v1810_v41 = vadd.f32 %v1809_v39, %v1808_v6 }
 0x9eb   :  { %v2894_v28 = vpop.eup %2893  ;;  %v1911_v61 = vsel %vm40_vm0, %v1889_v49, 0.0  ;;  %v1869_v45 = vmul.f32 %v2892_v59, %v3430_v32  ;;  %v1807_v14 = vadd.f32 %v1806_v52, %v1805_v18  ;;  %v1818_v0 = vrot.slane %v1817_v53, 2 }
 0x9ec   :  { %v1912_v38 = vrot.slane %v1911_v61, 4  ;;  %v1904_v20 = vsel %vm40_vm0, %v1888_v17, 0.0  ;;  %v1868_v8 = vmul.f32 %v2894_v28, %v3432_v3  ;;  %v1800_v7 = vadd.f32 %v1799_v23, %v1798_v58 }
 0x9ed   :  { %v1905_v57 = vrot.slane %v1904_v20, 4  ;;  %v1891_v62 = vmul.f32 %v3475_v42, %v1869_v45  ;;  %2907 = vrcp.f32 %v1807_v14  ;;  %v1819_v29 = vadd.f32 %v1818_v0, %v1817_v53 }
 0x9ee   :  { %v2896_v19 = vpop.eup %2895  ;;  %v1913_v10 = vadd.f32 %v1912_v38, %v1911_v61  ;;  %v1890_v12 = vmul.f32 %v3475_v42, %v1868_v8  ;;  %2909 = vrcp.f32 %v1800_v7  ;;  %v1811_v55 = vrot.slane %v1810_v41, 2 }
 0x9ef   :  { %v2898_v32 = vpop.eup %2897  ;;  %v1906_v6 = vadd.f32 %v1905_v57, %v1904_v20  ;;  %v1925_v35 = vsel %vm40_vm0, %v1891_v62, 0.0  ;;  %v1871_v30 = vmul.f32 %v2896_v19, %v3438_v56  ;;  %v1820_v22 = vrot.slane %v1819_v29, 1 }
 0x9f0   :  { %v1914_v3 = vrot.slane %v1913_v10, 2  ;;  %v1926_v25 = vrot.slane %v1925_v35, 4  ;;  %v1918_v54 = vsel %vm40_vm0, %v1890_v12, 0.0  ;;  %v1870_v26 = vmul.f32 %v2898_v32, %v3440_v63 }
 0x9f1   :  { %v3490_v27 = vpop.eup %2899  ;;  %v1907_v18 = vrot.slane %v1906_v6, 2  ;;  %v1919_v39 = vrot.slane %v1918_v54, 4  ;;  %v1893_v43 = vmul.f32 %v3475_v42, %v1871_v30  ;;  %v1821_v15 = vadd.f32 %v1820_v22, %v1819_v29  ;;  %v3511_v22 = vpop.permute.xlu0 %1884 }
 0x9f2   :  { %v2902_v58 = vpop.eup %2901  ;;  %v1915_v49 = vadd.f32 %v1914_v3, %v1913_v10  ;;  %v1927_v52 = vadd.f32 %v1926_v25, %v1925_v35  ;;  %v1892_v53 = vmul.f32 %v3475_v42, %v1870_v26  ;;  %v1812_v56 = vadd.f32 %v1811_v55, %v1810_v41 }
 0x9f3   :  { %v3494_v59 = vpop.eup %2903  ;;  %v1908_v17 = vadd.f32 %v1907_v18, %v1906_v6  ;;  %v1920_v23 = vadd.f32 %v1919_v39, %v1918_v54  ;;  %v1939_v28 = vsel %vm40_vm0, %v1893_v43, 0.0  ;;  %v1873_v63 = vmul.f32 %v2902_v58, %v3446_v44 }
 0x9f4   :  { %v2906_v61 = vpop.eup %2905  ;;  %v1916_v45 = vrot.slane %v1915_v49, 1  ;;  %v1928_v14 = vrot.slane %v1927_v52, 2  ;;  %v1932_v0 = vsel %vm40_vm0, %v1892_v53, 0.0  ;;  %v1736_v38 = vmul.f32 1.442695, %v3454_v33 }
 0x9f5   :  { %v1909_v20 = vrot.slane %v1908_v17, 1  ;;  %v1921_v8 = vrot.slane %v1920_v23, 2  ;;  %v1940_v7 = vrot.slane %v1939_v28, 4  ;;  %v1933_v57 = vrot.slane %v1932_v0, 4 }
 0x9f6   :  { %v3501_v41 = vmul.f32 %v3475_v42, %v1873_v63  ;;  %v1872_v62 = vmul.f32 %v2906_v61, %v3448_v9  ;;  %2911 = vrcp.f32 %v1821_v15  ;;  %v1813_v29 = vrot.slane %v1812_v56, 1 }
 0x9f7   :  { %v2908_v19 = vpop.eup %2907  ;;  %v3504_v44 = vadd.f32 %v1916_v45, %v1915_v49  ;;  %v3506_v10 = vadd.f32 %v1909_v20, %v1908_v17  ;;  %v1922_v12 = vadd.f32 %v1921_v8, %v1920_v23  ;;  %v1829_v33 = vsel %vm40_vm0, %v3490_v27, 0.0 }
 0x9f8   :  { %v2910_v55 = vpop.eup %2909  ;;  %v1934_v32 = vadd.f32 %v1933_v57, %v1932_v0  ;;  %v1875_v6 = vmul.f32 %v2908_v19, %v3456_v4  ;;  %v1814_v35 = vadd.f32 %v1813_v29, %v1812_v56  ;;  %v1830_v30 = vrot.slane %v1829_v33, 4 }
 0x9f9   :  { %v1894_v9 = vmul.f32 %v3475_v42, %v1872_v62  ;;  %v1874_v3 = vmul.f32 %v2910_v55, %v3460_v31  ;;  %v1822_v25 = vsel %vm40_vm0, %v3494_v59, 0.0  ;;  %2913 = vpow2.f32 %v1736_v38 }
 0x9fa   :  { %v1897_v54 = vmul.f32 %v3511_v22, %v1875_v6  ;;  %2915 = vrcp.f32 %v1814_v35  ;;  %v1831_v26 = vadd.f32 %v1830_v30, %v1829_v33  ;;  %v1823_v18 = vrot.slane %v1822_v25, 4 }
 0x9fb   :  { %v1923_v39 = vrot.slane %v1922_v12, 1  ;;  %v1896_v4 = vmul.f32 %v3511_v22, %v1874_v3  ;;  %v1734_v43 = vmul.f32 1.442695, %v3458_v40  ;;  %v1929_v15 = vadd.f32 %v1928_v14, %v1927_v52 }
 0x9fc   :  { %v1967_v58 = vsel %vm40_vm0, %v1897_v54, 0.0  ;;  %v1832_v42 = vrot.slane %v1831_v26, 2  ;;  %v1824_v49 = vadd.f32 %v1823_v18, %v1822_v25  ;;  %v1935_v31 = vrot.slane %v1934_v32, 2 }
 0x9fd   :  { %v1968_v53 = vrot.slane %v1967_v58, 4  ;;  %v1960_v56 = vsel %vm40_vm0, %v1896_v4, 0.0  ;;  %2917 = vpow2.f32 %v1734_v43  ;;  %v1930_v17 = vrot.slane %v1929_v15, 1 }
 0x9fe   :  { %v1961_v23 = vrot.slane %v1960_v56, 4  ;;  %v1833_v63 = vadd.f32 %v1832_v42, %v1831_v26  ;;  %v1825_v61 = vrot.slane %v1824_v49, 2  ;;  %v1936_v45 = vadd.f32 %v1935_v31, %v1934_v32 }
 0x9ff   :  { %v1969_v0 = vadd.f32 %v1968_v53, %v1967_v58  ;;  %v1924_v38 = vadd.f32 %v1923_v39, %v1922_v12  ;;  %v1941_v20 = vadd.f32 %v1940_v7, %v1939_v28  ;;  %v1946_v40 = vsel %vm40_vm0, %v1894_v9, 0.0 }
 0xa00   :  { %v2912_v52 = vpop.eup %2911  ;;  %v1962_v14 = vadd.f32 %v1961_v23, %v1960_v56  ;;  %v1834_v8 = vrot.slane %v1833_v63, 1  ;;  %v1826_v57 = vadd.f32 %v1825_v61, %v1824_v49  ;;  %v1931_v62 = vadd.f32 %v1930_v17, %v1929_v15 }
 0xa01   :  { %v1970_v29 = vrot.slane %v1969_v0, 2  ;;  %v1877_v19 = vmul.f32 %v2912_v52, %v3466_v37  ;;  %v1942_v33 = vrot.slane %v1941_v20, 2  ;;  %v1947_v55 = vrot.slane %v1946_v40, 4 }
 0xa02   :  { %v1963_v6 = vrot.slane %v1962_v14, 2  ;;  %v1835_v35 = vadd.f32 %v1834_v8, %v1833_v63  ;;  %v1827_v30 = vrot.slane %v1826_v57, 1  ;;  %v1937_v3 = vrot.slane %v1936_v45, 1 }
 0xa03   :  { %v3524_v32 = vpop.eup %2913  ;;  %v1971_v12 = vadd.f32 %v1970_v29, %v1969_v0  ;;  %v1899_v28 = vmul.f32 %v3511_v22, %v1877_v19  ;;  %v1943_v7 = vadd.f32 %v1942_v33, %v1941_v20  ;;  %v1948_v9 = vadd.f32 %v1947_v55, %v1946_v40 }
 0xa04   :  { %v2916_v25 = vpop.eup %2915  ;;  %v1964_v54 = vadd.f32 %v1963_v6, %v1962_v14  ;;  %2919 = vrcp.f32 %v1835_v35  ;;  %v1828_v26 = vadd.f32 %v1827_v30, %v1826_v57  ;;  %v1843_v37 = vsel %vm40_vm0, %v3524_v32, 0.0 }
 0xa05   :  { %v1972_v18 = vrot.slane %v1971_v12, 1  ;;  %v1981_v39 = vsel %vm40_vm0, %v1899_v28, 0.0  ;;  %v1876_v4 = vmul.f32 %v2916_v25, %v3468_v5  ;;  %v1844_v43 = vrot.slane %v1843_v37, 4 }
 0xa06   :  { %v1965_v15 = vrot.slane %v1964_v54, 1  ;;  %v1982_v58 = vrot.slane %v1981_v39, 4  ;;  %2921 = vrcp.f32 %v1828_v26  ;;  %v1938_v42 = vadd.f32 %v1937_v3, %v1936_v45 }
 0xa07   :  { %v3531_v49 = vpop.eup %2917  ;;  %v1898_v31 = vmul.f32 %v3511_v22, %v1876_v4  ;;  %v1845_v53 = vadd.f32 %v1844_v43, %v1843_v37  ;;  %v1944_v56 = vrot.slane %v1943_v7, 1  ;;  %v1949_v17 = vrot.slane %v1948_v9, 2 }
 0xa08   :  { %v1973_v23 = vadd.f32 %v1972_v18, %v1971_v12  ;;  %v1966_v63 = vadd.f32 %v1965_v15, %v1964_v54  ;;  %v1983_v61 = vadd.f32 %v1982_v58, %v1981_v39  ;;  %v1836_v0 = vsel %vm40_vm0, %v3531_v49, 0.0 }
 0xa09   :  { %v1974_v5 = vsel %vm40_vm0, %v1898_v31, 0.0  ;;  %v1846_v20 = vrot.slane %v1845_v53, 2  ;;  %v1837_v40 = vrot.slane %v1836_v0, 4  ;;  %v1950_v52 = vadd.f32 %v1949_v17, %v1948_v9 }
 0xa0a   :  { %v1984_v14 = vrot.slane %v1983_v61, 2  ;;  %v1975_v45 = vrot.slane %v1974_v5, 4  ;;  %v1953_v8 = vsel %vm40_vm0, %v3501_v41, 0.0  ;;  %v2032_v57 = vsel %vm863_vm1, %v3504_v44, %v3506_v10 }
 0xa0b   :  { %v1847_v29 = vadd.f32 %v1846_v20, %v1845_v53  ;;  %v1838_v19 = vadd.f32 %v1837_v40, %v1836_v0  ;;  %v1951_v33 = vrot.slane %v1950_v52, 1  ;;  %v1954_v55 = vrot.slane %v1953_v8, 4 }
 0xa0c   :  { %v1985_v6 = vadd.f32 %v1984_v14, %v1983_v61  ;;  %v1976_v35 = vadd.f32 %v1975_v45, %v1974_v5  ;;  %v2033_v30 = vsel %vm865_vm2, %v1924_v38, %v2032_v57  ;;  %v2039_v3 = vsel %vm863_vm1, %v1973_v23, %v1966_v63 }
 0xa0d   :  { %v1848_v12 = vrot.slane %v1847_v29, 1  ;;  %v1839_v28 = vrot.slane %v1838_v19, 2  ;;  %v1955_v9 = vadd.f32 %v1954_v55, %v1953_v8  ;;  %v1952_v41 = vadd.f32 %v1951_v33, %v1950_v52 }
 0xa0e   :  { %v2920_v25 = vpop.eup %2919  ;;  %v1977_v54 = vrot.slane %v1976_v35, 2  ;;  %v2034_v26 = vsel %vm867_vm3, %v1931_v62, %v2033_v30  ;;  %v1986_v4 = vrot.slane %v1985_v6, 1  ;;  %v1945_v15 = vadd.f32 %v1944_v56, %v1943_v7 }
 0xa0f   :  { %v1879_v44 = vmul.f32 %v2920_v25, %v3490_v27  ;;  %v1849_v10 = vadd.f32 %v1848_v12, %v1847_v29  ;;  %v1840_v37 = vadd.f32 %v1839_v28, %v1838_v19  ;;  %v1956_v18 = vrot.slane %v1955_v9, 2 }
 0xa10   :  { %v2922_v39 = vpop.eup %2921  ;;  %v1978_v43 = vadd.f32 %v1977_v54, %v1976_v35  ;;  %v2035_v38 = vsel %vm869_vm4, %v1938_v42, %v2034_v26 }
 0xa11   :  { %v1901_v58 = vmul.f32 %v3511_v22, %v1879_v44  ;;  %v1878_v31 = vmul.f32 %v2922_v39, %v3494_v59  ;;  %2923 = vrcp.f32 %v1849_v10  ;;  %v1841_v53 = vrot.slane %v1840_v37, 1 }
 0xa12   :  { %v1979_v17 = vrot.slane %v1978_v43, 1  ;;  %v1957_v23 = vadd.f32 %v1956_v18, %v1955_v9  ;;  %v2036_v62 = vsel %vm871_vm5, %v1945_v15, %v2035_v38  ;;  %v1987_v59 = vadd.f32 %v1986_v4, %v1985_v6 }
 0xa13   :  { %v1995_v27 = vsel %vm40_vm0, %v1901_v58, 0.0  ;;  %v1900_v63 = vmul.f32 %v3511_v22, %v1878_v31  ;;  %v1842_v61 = vadd.f32 %v1841_v53, %v1840_v37  ;;  %v2037_v0 = vsel %vm873_vm6, %v1952_v41, %v2036_v62 }
 0xa14   :  { %v1980_v7 = vadd.f32 %v1979_v17, %v1978_v43  ;;  %v1996_v56 = vrot.slane %v1995_v27, 4  ;;  %v1958_v42 = vrot.slane %v1957_v23, 1 }
 0xa15   :  { %v1988_v5 = vsel %vm40_vm0, %v1900_v63, 0.0  ;;  %2925 = vrcp.f32 %v1842_v61 }
 0xa16   :  { %v1997_v20 = vadd.f32 %v1996_v56, %v1995_v27  ;;  %v1989_v40 = vrot.slane %v1988_v5, 4  ;;  %v1959_v52 = vadd.f32 %v1958_v42, %v1957_v23  ;;  %v2040_v14 = vsel %vm865_vm2, %v1980_v7, %v2039_v3 }
 0xa17   :  { %v2041_v45 = vsel %vm867_vm3, %v1987_v59, %v2040_v14 }
 0xa18   :  { %v1990_v8 = vadd.f32 %v1989_v40, %v1988_v5  ;;  %v2038_v57 = vsel %vm875_vm7, %v1959_v52, %v2037_v0  ;;  %v1998_v29 = vrot.slane %v1997_v20, 2 }
 0xa19   :  { %2638 = vmatprep.mubr.msk.f32.mxu1 %vm40_vm0, %v2038_v57 }
 0xa1a   :  { %v1991_v19 = vrot.slane %v1990_v8, 2  ;;  %v1999_v33 = vadd.f32 %v1998_v29, %v1997_v20 }
 0xa1b   :  { %v2924_v55 = vpop.eup %2923 }
 0xa1c   :  { %v1881_v35 = vmul.f32 %v2924_v55, %v3524_v32  ;;  %v1992_v30 = vadd.f32 %v1991_v19, %v1990_v8  ;;  %v2000_v6 = vrot.slane %v1999_v33, 1 }
 0xa1e   :  { %v1903_v12 = vmul.f32 %v3511_v22, %v1881_v35  ;;  %v1993_v28 = vrot.slane %v1992_v30, 1  ;;  %v2001_v41 = vadd.f32 %v2000_v6, %v1999_v33 }
 0xa1f   :  { %v2926_v9 = vpop.eup %2925 }
 0xa20   :  { %v1880_v3 = vmul.f32 %v2926_v9, %v3531_v49  ;;  %v1994_v25 = vadd.f32 %v1993_v28, %v1992_v30  ;;  %v2009_v54 = vsel %vm40_vm0, %v1903_v12, 0.0 }
 0xa21   :  { %v2010_v26 = vrot.slane %v2009_v54, 4 }
 0xa22   :  { %v1902_v44 = vmul.f32 %v3511_v22, %v1880_v3  ;;  %v2042_v10 = vsel %vm869_vm4, %v1994_v25, %v2041_v45 }
 0xa23   :  { %v2011_v37 = vadd.f32 %v2010_v26, %v2009_v54  ;;  %v2043_v32 = vsel %vm871_vm5, %v2001_v41, %v2042_v10 }
 0xa24   :  { %v2002_v18 = vsel %vm40_vm0, %v1902_v44, 0.0 }
 0xa25   :  { %v2003_v39 = vrot.slane %v2002_v18, 4  ;;  %v2012_v4 = vrot.slane %v2011_v37, 2 }
 0xa27   :  { %v2004_v43 = vadd.f32 %v2003_v39, %v2002_v18  ;;  %v2013_v15 = vadd.f32 %v2012_v4, %v2011_v37 }
 0xa29   :  { %v2005_v38 = vrot.slane %v2004_v43, 2  ;;  %v2014_v58 = vrot.slane %v2013_v15, 1 }
 0xa2b   :  { %v2006_v49 = vadd.f32 %v2005_v38, %v2004_v43  ;;  %v2015_v17 = vadd.f32 %v2014_v58, %v2013_v15 }
 0xa2d   :  { %v2007_v31 = vrot.slane %v2006_v49, 1 }
 0xa2f   :  { %v2008_v53 = vadd.f32 %v2007_v31, %v2006_v49 }
 0xa31   :  { %v2044_v23 = vsel %vm873_vm6, %v2008_v53, %v2043_v32 }
 0xa32   :  { %v2045_v22 = vsel %vm875_vm7, %v2015_v17, %v2044_v23 }
 0xa33   :  { %2639 = vmatmul.mubr.msk.f32.vlgmr.msra.gmra.mrb[18].mxu1 %vm40_vm0, %v2045_v22 }
 0xa34   :  { %2746 = vmatpush3.bf16.msra.mxu1 %v2996_v11 }
 0xa35   :  { %2748 = vmatprep.subr.bf16.mxu1 %v3002_v13 }
 0xa38   :  { %2750 = vmatpush3.bf16.msra.mxu1 %v3002_v13 }
 0xa39   :  { %2752 = vmatprep.subr.bf16.mxu1 %v3288_v24 }
 0xb06   :  { %v2640_v62 = vpop.f32.mrb[18].mxu1 }
 0xb07   :  { %v2122_v27 = vadd.f32 %v2640_v62, %v3258_v1  ;;  %v2116_v63 = vpop.f32.mrb[19].mxu1 }
 0xb08   :  { %v2117_v61 = vadd.f32 %v2116_v63, %v3258_v1 }
 0xb09   :  { %v2126_v0 = vadd.f32 %v2122_v27, %v3362_v34 }
 0xb0a   :  { %v2125_v7 = vadd.f32 %v2117_v61, %v3359_v50 }
 0xb0b   :  { %v2130_v56 = vsel %vm40_vm0, %v2126_v0, 0.0 }
 0xb0c   :  { %2131 = vadd.xlane.f32.xlu0 %v2130_v56  ;;  %v2127_v11 = vsel %vm40_vm0, %v2125_v7, 0.0 }
 0xb0d   :  { %2128 = vadd.xlane.f32.xlu1 %v2127_v11 }
 0xb99   :  { %v2132_v42 = vpop.xlane.xlu0 %2131 }
 0xb9a   :  { %v2134_v13 = vmul.f32 0.03125, %v2132_v42  ;;  %v2129_v5 = vpop.xlane.xlu1 %2128 }
 0xb9b   :  { %v2133_v59 = vmul.f32 0.03125, %v2129_v5 }
 0xb9c   :  { %v2136_v20 = vsub.f32 %v2126_v0, %v2134_v13 }
 0xb9d   :  { %v2135_v40 = vsub.f32 %v2125_v7, %v2133_v59 }
 0xb9e   :  { %v2138_v52 = vmul.f32 %v2136_v20, %v2136_v20 }
 0xb9f   :  { %v2137_v14 = vmul.f32 %v2135_v40, %v2135_v40 }
 0xba0   :  { %v2142_v1 = vsel %vm40_vm0, %v2138_v52, 0.0 }
 0xba1   :  { %2143 = vadd.xlane.f32.xlu1 %v2142_v1  ;;  %v2139_v34 = vsel %vm40_vm0, %v2137_v14, 0.0 }
 0xba2   :  { %2140 = vadd.xlane.f32.xlu0 %v2139_v34 }
 0xc2e   :  { %v2144_v50 = vpop.xlane.xlu1 %2143 }
 0xc2f   :  { %v2146_v45 = vmul.f32 0.03125, %v2144_v50  ;;  %v2141_v8 = vpop.xlane.xlu0 %2140 }
 0xc30   :  { %v2145_v57 = vmul.f32 0.03125, %v2141_v8 }
 0xc31   :  { %v2148_v29 = vadd.f32 1e-05, %v2146_v45 }
 0xc32   :  { %v2147_v19 = vadd.f32 1e-05, %v2145_v57 }
 0xc33   :  { %2927 = vrsqrt.f32 %v2148_v29 }
 0xc34   :  { %2929 = vrsqrt.f32 %v2147_v19 }
 0xc3d   :  { %v2928_v33 = vpop.eup %2927 }
 0xc3e   :  { %v2930_v55 = vpop.eup %2929  ;;  %v2152_v35 = vmul.f32 %v2928_v33, %v2136_v20 }
 0xc3f   :  { %v2151_v30 = vmul.f32 %v2930_v55, %v2135_v40 }
 0xc40   :  { %v2154_v6 = vmul.f32 %v2152_v35, %v3272_v21 }
 0xc41   :  { %v2153_v12 = vmul.f32 %v2151_v30, %v3272_v21 }
 0xc42   :  { %v2156_v9 = vadd.f32 %v2154_v6, %v3291_v46 }
 0xc43   :  { %v2155_v28 = vadd.f32 %v2153_v12, %v3291_v46 }
 0xc45   :  { %2649 = vmatprep.mubr.msk.f32.mxu1 %vm40_vm0, %v2155_v28 }
 0xc46   :  { %2650 = vmatmul.mubr.msk.f32.vlgmr.msra.gmra.mrb[20].mxu1 %vm40_vm0, %v2156_v9 }
 0xc47   :  { %2754 = vmatpush3.bf16.msra.mxu1 %v3288_v24 }
 0xc48   :  { %2756 = vmatprep.subr.bf16.mxu1 %v3304_v51 }
 0xc4b   :  { %2758 = vmatpush3.bf16.msra.mxu1 %v3304_v51 }
 0xc4c   :  { %2760 = vmatprep.subr.bf16.mxu1 %v3315_v16 }
 0xc4f   :  { %2762 = vmatpush3.bf16.msra.mxu1 %v3315_v16 }
 0xc50   :  { %2764 = vmatprep.subr.bf16.mxu1 %v3325_v60 }
 0xc53   :  { %2766 = vmatpush3.bf16.msra.mxu1 %v3325_v60 }
 0xd19   :  { %v2651_v21 = vpop.f32.mrb[20].mxu1 }
 0xd1a   :  { %v2235_v46 = vadd.f32 %v2651_v21, %v3331_v48  ;;  %v2229_v3 = vpop.f32.mrb[21].mxu1 }
 0xd1b   :  { %v2230_v25 = vadd.f32 %v2229_v3, %v3331_v48 }
 0xd1c   :  { %v2239_v24 = vmax.f32 %v2235_v46, 0.0 }
 0xd1d   :  { %v2238_v54 = vmax.f32 %v2230_v25, 0.0 }
 0xd1f   :  { %2668 = vmatprep.mubr.msk.f32.mxu1 %vm1110_vm8, %v2238_v54 }
 0xd20   :  { %2669 = vmatmul.mubr.msk.f32.vlgmr.msra.gmra.mrb[22].mxu1 %vm1110_vm8, %v2239_v24 }
 0xdf3   :  { %v2670_v51 = vpop.f32.mrb[22].mxu1 }
 0xdf4   :  { %v2318_v41 = vadd.f32 %v2670_v51, %v3340_v2  ;;  %v2312_v16 = vpop.f32.mrb[23].mxu1 }
 0xdf5   :  { %v2313_v26 = vadd.f32 %v2312_v16, %v3340_v2 }
 0xdf6   :  { %v2322_v44 = vadd.f32 %v2318_v41, %v2156_v9 }
 0xdf7   :  { %v2321_v60 = vadd.f32 %v2313_v26, %v2155_v28 }
 0xdf8   :  { %v2326_v10 = vsel %vm40_vm0, %v2322_v44, 0.0 }
 0xdf9   :  { %2327 = vadd.xlane.f32.xlu1 %v2326_v10  ;;  %v2323_v37 = vsel %vm40_vm0, %v2321_v60, 0.0 }
 0xdfa   :  { %2324 = vadd.xlane.f32.xlu0 %v2323_v37 }
 0xe86   :  { %v2328_v48 = vpop.xlane.xlu1 %2327 }
 0xe87   :  { %v2330_v32 = vmul.f32 0.03125, %v2328_v48  ;;  %v2325_v18 = vpop.xlane.xlu0 %2324 }
 0xe88   :  { %v2329_v39 = vmul.f32 0.03125, %v2325_v18 }
 0xe89   :  { %v2332_v4 = vsub.f32 %v2322_v44, %v2330_v32 }
 0xe8a   :  { %v2331_v43 = vsub.f32 %v2321_v60, %v2329_v39 }
 0xe8b   :  { %v2334_v15 = vmul.f32 %v2332_v4, %v2332_v4 }
 0xe8c   :  { %v2333_v38 = vmul.f32 %v2331_v43, %v2331_v43 }
 0xe8d   :  { %v2338_v49 = vsel %vm40_vm0, %v2334_v15, 0.0 }
 0xe8e   :  { %2339 = vadd.xlane.f32.xlu1 %v2338_v49  ;;  %v2335_v2 = vsel %vm40_vm0, %v2333_v38, 0.0 }
 0xe8f   :  { %2336 = vadd.xlane.f32.xlu0 %v2335_v2 }
 0xf1b   :  { %v2340_v58 = vpop.xlane.xlu1 %2339 }
 0xf1c   :  { %v2342_v31 = vmul.f32 0.03125, %v2340_v58  ;;  %v2337_v53 = vpop.xlane.xlu0 %2336 }
 0xf1d   :  { %v2341_v17 = vmul.f32 0.03125, %v2337_v53 }
 0xf1e   :  { %v2344_v23 = vadd.f32 1e-05, %v2342_v31 }
 0xf1f   :  { %v2343_v22 = vadd.f32 1e-05, %v2341_v17 }
 0xf20   :  { %2931 = vrsqrt.f32 %v2344_v23 }
 0xf21   :  { %2933 = vrsqrt.f32 %v2343_v22 }
 0xf2a   :  { %v2932_v62 = vpop.eup %2931 }
 0xf2b   :  { %v2934_v27 = vpop.eup %2933  ;;  %v2348_v63 = vmul.f32 %v2932_v62, %v2332_v4 }
 0xf2c   :  { %v2347_v61 = vmul.f32 %v2934_v27, %v2331_v43 }
 0xf2d   :  { %v2350_v0 = vmul.f32 %v2348_v63, %v3352_v36 }
 0xf2e   :  { %v2349_v7 = vmul.f32 %v2347_v61, %v3352_v36 }
 0xf2f   :  { %v2352_v56 = vadd.f32 %v2350_v0, %v3355_v47 }
 0xf30   :  { %v2351_v11 = vadd.f32 %v2349_v7, %v3355_v47 }
 0xf31   :  { %2354 = vst.msk [vmem:[%s3620_s4 + $0x8] sm:$0xff] %vm40_vm0, %v2352_v56 }
 0xf32   :  { %2353 = vst.msk [vmem:[%s3620_s4] sm:$0xff] %vm40_vm0, %v2351_v11 }

</bundles_post_ra>
